<compile_context>
chip_gen: v5e
topology: v5e:2x2
jax: 0.10.0
libtpu: 0.0.40
codegen_flags: <defaults>
</compile_context>

<pallas_src>
import numpy as np
import jax
import jax.numpy as jnp
from jax import lax
from jax.experimental import pallas as pl
from jax.experimental.pallas import tpu as pltpu

KSIZE = 7  # kernel_size (must be 3 or 7 in the torch module)


def _vmem_budget_bytes():
    """Per-generation scoped-VMEM budget (leave ~25% headroom for the compiler)."""
    try:
        cap = int(pltpu.get_tpu_info().vmem_capacity_bytes)
    except Exception:
        cap = 64 * 1024 * 1024          # conservative default (v7x per-core VMEM)
    return (cap * 3) // 4               # 48 MiB on v7x, ~96 MiB on v5e/v6e


def _pick_c_chunk(C, HW, itemsize, budget):
    """Largest legal channel tile whose double-buffered x block fits the budget."""
    # Resident/invariant VMEM: rc (2,HW i32, 2 bufs), out (1,HW, 2 bufs),
    # two (strip,HW f32) scratches, ~9 (2,HW f32) epilogue temporaries, slack.
    fixed = (2 * 2 * HW * 4) + (2 * HW * itemsize) + (2 * 8 * HW * 4) \
            + (9 * 2 * HW * 4) + (1 << 20)
    avail = max(budget - fixed, 2 * 8 * HW * itemsize)
    cap = max(8, avail // (2 * HW * itemsize))       # 2x = double buffering
    if C <= cap:
        return C                                     # whole channel dim in one block
    best = None
    for ct in range(8, int(min(cap, C)) + 1, 8):     # sublane rule: CT % 8 == 0
        if C % ct == 0:
            best = ct
    if best is not None:
        return best
    return C                                         # fallback: full C (block == dim)


def _make_kernel(H, W, HW, K, pad, strip, n_strips):
    def kernel(x_ref, w_ref, rc_ref, o_ref, sum_ref, max_ref):
        # x_ref  : (1, CT, HW)  input chunk (model dtype; upcast per strip)
        # w_ref  : (2, K*K)     f32 conv weights (row 0 = avg-channel * 1/C, row 1 = max)
        # rc_ref : (2, HW)      i32 row / col index of each flattened position
        # o_ref  : (1, 1, HW)   output attention map
        # sum_ref/max_ref : (strip, HW) f32 running accumulators (sublane strips)
        c = pl.program_id(1)

        @pl.when(c == 0)
        def _init():
            sum_ref[...] = jnp.zeros((strip, HW), jnp.float32)
            max_ref[...] = jnp.full((strip, HW), -jnp.inf, jnp.float32)

        # ---- steady state: elementwise add/max per strip (VPU only, no XLU) ----
        def body(i, carry):
            s, m = carry
            off = pl.multiple_of(i * strip, strip)
            xs = x_ref[0, pl.ds(off, strip), :].astype(jnp.float32)
            return s + xs, jnp.maximum(m, xs)

        acc_s, acc_m = lax.fori_loop(0, n_strips, body,
                                     (sum_ref[...], max_ref[...]), unroll=True)
        sum_ref[...] = acc_s
        max_ref[...] = acc_m

        # ---- epilogue (last chunk): separable 7x7 conv via 2K rolls + sigmoid ----
        @pl.when(c == pl.num_programs(1) - 1)
        def _epilogue():
            avg = jnp.sum(sum_ref[...], axis=0, keepdims=True)     # (1, HW)
            mx = jnp.max(max_ref[...], axis=0, keepdims=True)      # (1, HW)
            two = jnp.concatenate([avg, mx], axis=0)               # (2, HW)
            row = rc_ref[0:1, :]                                    # (1, HW) i32
            col = rc_ref[1:2, :]                                    # (1, HW) i32

            # Stage 1: K row rolls (lane shift (dy-pad)*W), row-bounds mask,
            # fold the 2*K*K weights into K per-dx partial sums.
            s_dx = [jnp.zeros((2, HW), jnp.float32) for _ in range(K)]
            for dy in range(K):
                shift = (-(dy - pad) * W) % HW
                r = two if shift == 0 else pltpu.roll(two, shift=shift, axis=1)
                rm = jnp.where((row >= pad - dy) & (row < H + pad - dy), r, 0.0)
                for dx in range(K):
                    t = dy * K + dx
                    w2 = w_ref[:, t:t + 1]                           # (2, 1)
                    s_dx[dx] = s_dx[dx] + w2 * rm

            # Stage 2: K column rolls (lane shift dx-pad), col-bounds mask.
            acc = jnp.zeros((2, HW), jnp.float32)
            for dx in range(K):
                shift = (-(dx - pad)) % HW
                s = s_dx[dx] if shift == 0 else pltpu.roll(s_dx[dx], shift=shift,
                                                           axis=1)
                acc = acc + jnp.where((col >= pad - dx) & (col < W + pad - dx),
                                      s, 0.0)
            conv = jnp.sum(acc, axis=0, keepdims=True)               # (1, HW)
            o_ref[0] = jax.nn.sigmoid(conv).astype(o_ref.dtype)

    return kernel


def spatial_attention(x, weight):
    """x: (N, C, H, W); weight: (1, 2, K, K) OIHW (in-ch 0 = avg, 1 = max)."""
    N, C, H, W = x.shape
    K = weight.shape[-1]
    assert K in (3, 7), "kernel size must be 3 or 7"
    pad = K // 2
    HW = H * W
    itemsize = jnp.dtype(x.dtype).itemsize

    budget = _vmem_budget_bytes()
    CT = _pick_c_chunk(C, HW, itemsize, budget)
    NC = C // CT
    strip = 8 if CT % 8 == 0 else CT
    n_strips = CT // strip

    # Tiny invariant inputs (HW-independent weights + row/col index table).
    wt = weight.astype(jnp.float32).reshape(2, K * K)
    w_in = jnp.stack([wt[0] / C, wt[1]], axis=0)                 # (2, K*K) f32
    rows = np.repeat(np.arange(H, dtype=np.int32), W)
    cols = np.tile(np.arange(W, dtype=np.int32), H)
    rc = jnp.asarray(np.stack([rows, cols], axis=0))             # (2, HW) i32

    xf = x.reshape(N, C, HW)       # lane-dense layout: HW in the lane axis

    kernel = _make_kernel(H, W, HW, K, pad, strip, n_strips)
    out = pl.pallas_call(
        kernel,
        out_shape=jax.ShapeDtypeStruct((N, 1, HW), x.dtype),
        grid=(N, NC),
        in_specs=[
            pl.BlockSpec((1, CT, HW), lambda n, c: (n, c, 0)),
            pl.BlockSpec((2, K * K), lambda n, c: (0, 0)),
            pl.BlockSpec((2, HW), lambda n, c: (0, 0)),
        ],
        out_specs=pl.BlockSpec((1, 1, HW), lambda n, c: (n, 0, 0)),
        scratch_shapes=[pltpu.VMEM((strip, HW), jnp.float32),
                        pltpu.VMEM((strip, HW), jnp.float32)],
        compiler_params=pltpu.CompilerParams(
            dimension_semantics=("parallel", "arbitrary"),
            vmem_limit_bytes=int(budget)),
    )(xf, w_in, rc)
    return out.reshape(N, 1, H, W)


def spatial_attention_ref(x, weight):
    """Pure-JAX reference mirroring the PyTorch forward."""
    K = weight.shape[-1]
    pad = K // 2
    avg_out = jnp.mean(x, axis=1, keepdims=True)
    max_out = jnp.max(x, axis=1, keepdims=True)
    xc = jnp.concatenate([avg_out, max_out], axis=1)             # (N, 2, H, W)
    y = lax.conv_general_dilated(
        xc, weight, window_strides=(1, 1),
        padding=((pad, pad), (pad, pad)),
        dimension_numbers=("NCHW", "OIHW", "NCHW"))
    return jax.nn.sigmoid(y)


if __name__ == "__main__":
    key = jax.random.PRNGKey(0)
    kx, kw = jax.random.split(key)

    N, C, H, W = 2, 4, 16, 16
    x = jax.random.normal(kx, (N, C, H, W), dtype=jnp.float32)
    # Deterministic conv weight init (kaiming-uniform-ish range for fan_in=2*7*7)
    fan_in = 2 * KSIZE * KSIZE
    bound = (1.0 / fan_in) ** 0.5
    weight = jax.random.uniform(kw, (1, 2, KSIZE, KSIZE),
                                minval=-bound, maxval=bound, dtype=jnp.float32)

    out = jax.block_until_ready(spatial_attention(x, weight))
    ref = jax.block_until_ready(spatial_attention_ref(x, weight))

    assert out.shape == (N, 1, H, W), out.shape
    assert jnp.allclose(out, ref, atol=1e-5, rtol=1e-5), float(jnp.max(jnp.abs(out - ref)))
    print("KERNEL_OK")
</pallas_src>

<mosaic_0001>
module attributes {stable_mosaic.version = 11 : i64} {
  func.func @kernel(%arg0: i32, %arg1: i32, %arg2: memref<1x4x256xf32, #tpu.memory_space<vmem>>, %arg3: memref<2x49xf32, #tpu.memory_space<vmem>>, %arg4: memref<2x256xi32, #tpu.memory_space<vmem>>, %arg5: memref<1x1x256xf32, #tpu.memory_space<vmem>>, %arg6: memref<4x256xf32, #tpu.memory_space<vmem>>, %arg7: memref<4x256xf32, #tpu.memory_space<vmem>>) attributes {dimension_semantics = [#tpu.dimension_semantics<parallel>, #tpu.dimension_semantics<arbitrary>], iteration_bounds = array<i64: 2, 1>, scalar_prefetch = 0 : i64, scratch_operands = 2 : i64, tpu.core_type = #tpu.core_type<tc>, window_params = [{transform_indices = @transform_0, window_bounds = array<i64: 1, 4, 256>}, {pipeline_mode = #tpu.pipeline_mode<synchronous>, transform_indices = @transform_1, window_bounds = array<i64: 2, 49>}, {pipeline_mode = #tpu.pipeline_mode<synchronous>, transform_indices = @transform_2, window_bounds = array<i64: 2, 256>}, {transform_indices = @transform_3, window_bounds = array<i64: 1, 1, 256>}]} {
    %c0_i32 = arith.constant 0 : i32
    %0 = arith.cmpi eq, %arg1, %c0_i32 : i32
    %1 = arith.extui %0 : i1 to i32
    %c0_i32_0 = arith.constant 0 : i32
    %2 = arith.cmpi ne, %1, %c0_i32_0 : i32
    scf.if %2 {
      %cst = arith.constant 0.000000e+00 : f32
      %17 = vector.broadcast %cst : f32 to vector<4x256xf32>
      %c0_13 = arith.constant 0 : index
      %c0_14 = arith.constant 0 : index
      %18 = vector.load %arg6[%c0_13, %c0_14] : memref<4x256xf32, #tpu.memory_space<vmem>>, vector<4x256xf32>
      tpu.vector_store %arg6[%c0_13, %c0_14], %17 {strides = array<i32>} : memref<4x256xf32, #tpu.memory_space<vmem>>, vector<4x256xf32>,
      %cst_15 = arith.constant 0xFF800000 : f32
      %19 = vector.broadcast %cst_15 : f32 to vector<4x256xf32>
      %c0_16 = arith.constant 0 : index
      %c0_17 = arith.constant 0 : index
      %20 = vector.load %arg7[%c0_16, %c0_17] : memref<4x256xf32, #tpu.memory_space<vmem>>, vector<4x256xf32>
      tpu.vector_store %arg7[%c0_16, %c0_17], %19 {strides = array<i32>} : memref<4x256xf32, #tpu.memory_space<vmem>>, vector<4x256xf32>,
    } else {
    }
    %c0 = arith.constant 0 : index
    %c0_1 = arith.constant 0 : index
    %3 = vector.load %arg6[%c0, %c0_1] : memref<4x256xf32, #tpu.memory_space<vmem>>, vector<4x256xf32>
    %c0_2 = arith.constant 0 : index
    %c0_3 = arith.constant 0 : index
    %4 = vector.load %arg7[%c0_2, %c0_3] : memref<4x256xf32, #tpu.memory_space<vmem>>, vector<4x256xf32>
    %c0_i32_4 = arith.constant 0 : i32
    %c4_i32 = arith.constant 4 : i32
    %5 = arith.muli %c0_i32_4, %c4_i32 : i32
    %6 = tpu.assume_multiple %5, 4 : i32
    %c0_5 = arith.constant 0 : index
    %7 = arith.index_cast %6 : i32 to index
    %c0_6 = arith.constant 0 : index
    %8 = vector.load %arg2[%c0_5, %7, %c0_6] : memref<1x4x256xf32, #tpu.memory_space<vmem>>, vector<1x4x256xf32>
    %9 = vector.shape_cast %8 : vector<1x4x256xf32> to vector<4x256xf32>
    %10 = arith.addf %3, %9 : vector<4x256xf32>
    %11 = arith.maximumf %4, %9 : vector<4x256xf32>
    %c1_i32 = arith.constant 1 : i32
    %c0_7 = arith.constant 0 : index
    %c0_8 = arith.constant 0 : index
    %12 = vector.load %arg6[%c0_7, %c0_8] : memref<4x256xf32, #tpu.memory_space<vmem>>, vector<4x256xf32>
    tpu.vector_store %arg6[%c0_7, %c0_8], %10 {strides = array<i32>} : memref<4x256xf32, #tpu.memory_space<vmem>>, vector<4x256xf32>,
    %c0_9 = arith.constant 0 : index
    %c0_10 = arith.constant 0 : index
    %13 = vector.load %arg7[%c0_9, %c0_10] : memref<4x256xf32, #tpu.memory_space<vmem>>, vector<4x256xf32>
    tpu.vector_store %arg7[%c0_9, %c0_10], %11 {strides = array<i32>} : memref<4x256xf32, #tpu.memory_space<vmem>>, vector<4x256xf32>,
    %c0_i32_11 = arith.constant 0 : i32
    %14 = arith.cmpi eq, %arg1, %c0_i32_11 : i32
    %15 = arith.extui %14 : i1 to i32
    %c0_i32_12 = arith.constant 0 : i32
    %16 = arith.cmpi ne, %15, %c0_i32_12 : i32
    scf.if %16 {
      %c0_13 = arith.constant 0 : index
      %c0_14 = arith.constant 0 : index
      %17 = vector.load %arg6[%c0_13, %c0_14] : memref<4x256xf32, #tpu.memory_space<vmem>>, vector<4x256xf32>
      %cst = arith.constant dense<0.000000e+00> : vector<256xf32>
      %18 = vector.multi_reduction <add>, %17, %cst [0] : vector<4x256xf32> to vector<256xf32>
      %19 = vector.shape_cast %18 : vector<256xf32> to vector<1x256xf32>
      %c0_15 = arith.constant 0 : index
      %c0_16 = arith.constant 0 : index
      %20 = vector.load %arg7[%c0_15, %c0_16] : memref<4x256xf32, #tpu.memory_space<vmem>>, vector<4x256xf32>
      %cst_17 = arith.constant dense<0xFF800000> : vector<256xf32>
      %21 = vector.multi_reduction <maximumf>, %20, %cst_17 [0] : vector<4x256xf32> to vector<256xf32>
      %22 = vector.shape_cast %21 : vector<256xf32> to vector<1x256xf32>
      %23 = tpu.concatenate %19, %22 in 0 : vector<1x256xf32>, vector<1x256xf32> -> vector<2x256xf32>
      %c0_18 = arith.constant 0 : index
      %c0_19 = arith.constant 0 : index
      %24 = vector.load %arg4[%c0_18, %c0_19] : memref<2x256xi32, #tpu.memory_space<vmem>>, vector<1x256xi32>
      %c1 = arith.constant 1 : index
      %c0_20 = arith.constant 0 : index
      %25 = vector.load %arg4[%c1, %c0_20] : memref<2x256xi32, #tpu.memory_space<vmem>>, vector<1x256xi32>
      %cst_21 = arith.constant 0.000000e+00 : f32
      %26 = vector.broadcast %cst_21 : f32 to vector<2x256xf32>
      %cst_22 = arith.constant 0.000000e+00 : f32
      %27 = vector.broadcast %cst_22 : f32 to vector<2x256xf32>
      %cst_23 = arith.constant 0.000000e+00 : f32
      %28 = vector.broadcast %cst_23 : f32 to vector<2x256xf32>
      %cst_24 = arith.constant 0.000000e+00 : f32
      %29 = vector.broadcast %cst_24 : f32 to vector<2x256xf32>
      %cst_25 = arith.constant 0.000000e+00 : f32
      %30 = vector.broadcast %cst_25 : f32 to vector<2x256xf32>
      %cst_26 = arith.constant 0.000000e+00 : f32
      %31 = vector.broadcast %cst_26 : f32 to vector<2x256xf32>
      %cst_27 = arith.constant 0.000000e+00 : f32
      %32 = vector.broadcast %cst_27 : f32 to vector<2x256xf32>
      %c48_i32 = arith.constant 48 : i32
      %33 = tpu.dynamic_rotate %23 by %c48_i32 dim 1 : vector<2x256xf32>, i32 -> vector<2x256xf32>
      %c3_i32 = arith.constant 3 : i32
      %34 = vector.broadcast %c3_i32 : i32 to vector<1x256xi32>
      %35 = arith.cmpi sge, %24, %34 : vector<1x256xi32>
      %c19_i32 = arith.constant 19 : i32
      %36 = vector.broadcast %c19_i32 : i32 to vector<1x256xi32>
      %37 = arith.cmpi slt, %24, %36 : vector<1x256xi32>
      %38 = arith.andi %35, %37 : vector<1x256xi1>
      %cst_28 = arith.constant 0.000000e+00 : f32
      %39 = vector.shape_cast %38 : vector<1x256xi1> to vector<1x256xi1>
      %40 = vector.broadcast %39 : vector<1x256xi1> to vector<2x256xi1>
      %41 = vector.broadcast %cst_28 : f32 to vector<2x256xf32>
      %42 = arith.select %40, %33, %41 : vector<2x256xi1>, vector<2x256xf32>
      %c0_29 = arith.constant 0 : index
      %c0_30 = arith.constant 0 : index
      %43 = vector.load %arg3[%c0_29, %c0_30] : memref<2x49xf32, #tpu.memory_space<vmem>>, vector<2x1xf32>
      %44 = vector.broadcast %43 : vector<2x1xf32> to vector<2x256xf32>
      %45 = arith.mulf %44, %42 : vector<2x256xf32>
      %46 = arith.addf %26, %45 : vector<2x256xf32>
      %c0_31 = arith.constant 0 : index
      %c1_32 = arith.constant 1 : index
      %47 = vector.load %arg3[%c0_31, %c1_32] : memref<2x49xf32, #tpu.memory_space<vmem>>, vector<2x1xf32>
      %48 = vector.broadcast %47 : vector<2x1xf32> to vector<2x256xf32>
      %49 = arith.mulf %48, %42 : vector<2x256xf32>
      %50 = arith.addf %27, %49 : vector<2x256xf32>
      %c0_33 = arith.constant 0 : index
      %c2 = arith.constant 2 : index
      %51 = vector.load %arg3[%c0_33, %c2] : memref<2x49xf32, #tpu.memory_space<vmem>>, vector<2x1xf32>
      %52 = vector.broadcast %51 : vector<2x1xf32> to vector<2x256xf32>
      %53 = arith.mulf %52, %42 : vector<2x256xf32>
      %54 = arith.addf %28, %53 : vector<2x256xf32>
      %c0_34 = arith.constant 0 : index
      %c3 = arith.constant 3 : index
      %55 = vector.load %arg3[%c0_34, %c3] : memref<2x49xf32, #tpu.memory_space<vmem>>, vector<2x1xf32>
      %56 = vector.broadcast %55 : vector<2x1xf32> to vector<2x256xf32>
      %57 = arith.mulf %56, %42 : vector<2x256xf32>
      %58 = arith.addf %29, %57 : vector<2x256xf32>
      %c0_35 = arith.constant 0 : index
      %c4 = arith.constant 4 : index
      %59 = vector.load %arg3[%c0_35, %c4] : memref<2x49xf32, #tpu.memory_space<vmem>>, vector<2x1xf32>
      %60 = vector.broadcast %59 : vector<2x1xf32> to vector<2x256xf32>
      %61 = arith.mulf %60, %42 : vector<2x256xf32>
      %62 = arith.addf %30, %61 : vector<2x256xf32>
      %c0_36 = arith.constant 0 : index
      %c5 = arith.constant 5 : index
      %63 = vector.load %arg3[%c0_36, %c5] : memref<2x49xf32, #tpu.memory_space<vmem>>, vector<2x1xf32>
      %64 = vector.broadcast %63 : vector<2x1xf32> to vector<2x256xf32>
      %65 = arith.mulf %64, %42 : vector<2x256xf32>
      %66 = arith.addf %31, %65 : vector<2x256xf32>
      %c0_37 = arith.constant 0 : index
      %c6 = arith.constant 6 : index
      %67 = vector.load %arg3[%c0_37, %c6] : memref<2x49xf32, #tpu.memory_space<vmem>>, vector<2x1xf32>
      %68 = vector.broadcast %67 : vector<2x1xf32> to vector<2x256xf32>
      %69 = arith.mulf %68, %42 : vector<2x256xf32>
      %70 = arith.addf %32, %69 : vector<2x256xf32>
      %c32_i32 = arith.constant 32 : i32
      %71 = tpu.dynamic_rotate %23 by %c32_i32 dim 1 : vector<2x256xf32>, i32 -> vector<2x256xf32>
      %c2_i32 = arith.constant 2 : i32
      %72 = vector.broadcast %c2_i32 : i32 to vector<1x256xi32>
      %73 = arith.cmpi sge, %24, %72 : vector<1x256xi32>
      %c18_i32 = arith.constant 18 : i32
      %74 = vector.broadcast %c18_i32 : i32 to vector<1x256xi32>
      %75 = arith.cmpi slt, %24, %74 : vector<1x256xi32>
      %76 = arith.andi %73, %75 : vector<1x256xi1>
      %cst_38 = arith.constant 0.000000e+00 : f32
      %77 = vector.shape_cast %76 : vector<1x256xi1> to vector<1x256xi1>
      %78 = vector.broadcast %77 : vector<1x256xi1> to vector<2x256xi1>
      %79 = vector.broadcast %cst_38 : f32 to vector<2x256xf32>
      %80 = arith.select %78, %71, %79 : vector<2x256xi1>, vector<2x256xf32>
      %c0_39 = arith.constant 0 : index
      %c7 = arith.constant 7 : index
      %81 = vector.load %arg3[%c0_39, %c7] : memref<2x49xf32, #tpu.memory_space<vmem>>, vector<2x1xf32>
      %82 = vector.broadcast %81 : vector<2x1xf32> to vector<2x256xf32>
      %83 = arith.mulf %82, %80 : vector<2x256xf32>
      %84 = arith.addf %46, %83 : vector<2x256xf32>
      %c0_40 = arith.constant 0 : index
      %c8 = arith.constant 8 : index
      %85 = vector.load %arg3[%c0_40, %c8] : memref<2x49xf32, #tpu.memory_space<vmem>>, vector<2x1xf32>
      %86 = vector.broadcast %85 : vector<2x1xf32> to vector<2x256xf32>
      %87 = arith.mulf %86, %80 : vector<2x256xf32>
      %88 = arith.addf %50, %87 : vector<2x256xf32>
      %c0_41 = arith.constant 0 : index
      %c9 = arith.constant 9 : index
      %89 = vector.load %arg3[%c0_41, %c9] : memref<2x49xf32, #tpu.memory_space<vmem>>, vector<2x1xf32>
      %90 = vector.broadcast %89 : vector<2x1xf32> to vector<2x256xf32>
      %91 = arith.mulf %90, %80 : vector<2x256xf32>
      %92 = arith.addf %54, %91 : vector<2x256xf32>
      %c0_42 = arith.constant 0 : index
      %c10 = arith.constant 10 : index
      %93 = vector.load %arg3[%c0_42, %c10] : memref<2x49xf32, #tpu.memory_space<vmem>>, vector<2x1xf32>
      %94 = vector.broadcast %93 : vector<2x1xf32> to vector<2x256xf32>
      %95 = arith.mulf %94, %80 : vector<2x256xf32>
      %96 = arith.addf %58, %95 : vector<2x256xf32>
      %c0_43 = arith.constant 0 : index
      %c11 = arith.constant 11 : index
      %97 = vector.load %arg3[%c0_43, %c11] : memref<2x49xf32, #tpu.memory_space<vmem>>, vector<2x1xf32>
      %98 = vector.broadcast %97 : vector<2x1xf32> to vector<2x256xf32>
      %99 = arith.mulf %98, %80 : vector<2x256xf32>
      %100 = arith.addf %62, %99 : vector<2x256xf32>
      %c0_44 = arith.constant 0 : index
      %c12 = arith.constant 12 : index
      %101 = vector.load %arg3[%c0_44, %c12] : memref<2x49xf32, #tpu.memory_space<vmem>>, vector<2x1xf32>
      %102 = vector.broadcast %101 : vector<2x1xf32> to vector<2x256xf32>
      %103 = arith.mulf %102, %80 : vector<2x256xf32>
      %104 = arith.addf %66, %103 : vector<2x256xf32>
      %c0_45 = arith.constant 0 : index
      %c13 = arith.constant 13 : index
      %105 = vector.load %arg3[%c0_45, %c13] : memref<2x49xf32, #tpu.memory_space<vmem>>, vector<2x1xf32>
      %106 = vector.broadcast %105 : vector<2x1xf32> to vector<2x256xf32>
      %107 = arith.mulf %106, %80 : vector<2x256xf32>
      %108 = arith.addf %70, %107 : vector<2x256xf32>
      %c16_i32 = arith.constant 16 : i32
      %109 = tpu.dynamic_rotate %23 by %c16_i32 dim 1 : vector<2x256xf32>, i32 -> vector<2x256xf32>
      %c1_i32_46 = arith.constant 1 : i32
      %110 = vector.broadcast %c1_i32_46 : i32 to vector<1x256xi32>
      %111 = arith.cmpi sge, %24, %110 : vector<1x256xi32>
      %c17_i32 = arith.constant 17 : i32
      %112 = vector.broadcast %c17_i32 : i32 to vector<1x256xi32>
      %113 = arith.cmpi slt, %24, %112 : vector<1x256xi32>
      %114 = arith.andi %111, %113 : vector<1x256xi1>
      %cst_47 = arith.constant 0.000000e+00 : f32
      %115 = vector.shape_cast %114 : vector<1x256xi1> to vector<1x256xi1>
      %116 = vector.broadcast %115 : vector<1x256xi1> to vector<2x256xi1>
      %117 = vector.broadcast %cst_47 : f32 to vector<2x256xf32>
      %118 = arith.select %116, %109, %117 : vector<2x256xi1>, vector<2x256xf32>
      %c0_48 = arith.constant 0 : index
      %c14 = arith.constant 14 : index
      %119 = vector.load %arg3[%c0_48, %c14] : memref<2x49xf32, #tpu.memory_space<vmem>>, vector<2x1xf32>
      %120 = vector.broadcast %119 : vector<2x1xf32> to vector<2x256xf32>
      %121 = arith.mulf %120, %118 : vector<2x256xf32>
      %122 = arith.addf %84, %121 : vector<2x256xf32>
      %c0_49 = arith.constant 0 : index
      %c15 = arith.constant 15 : index
      %123 = vector.load %arg3[%c0_49, %c15] : memref<2x49xf32, #tpu.memory_space<vmem>>, vector<2x1xf32>
      %124 = vector.broadcast %123 : vector<2x1xf32> to vector<2x256xf32>
      %125 = arith.mulf %124, %118 : vector<2x256xf32>
      %126 = arith.addf %88, %125 : vector<2x256xf32>
      %c0_50 = arith.constant 0 : index
      %c16 = arith.constant 16 : index
      %127 = vector.load %arg3[%c0_50, %c16] : memref<2x49xf32, #tpu.memory_space<vmem>>, vector<2x1xf32>
      %128 = vector.broadcast %127 : vector<2x1xf32> to vector<2x256xf32>
      %129 = arith.mulf %128, %118 : vector<2x256xf32>
      %130 = arith.addf %92, %129 : vector<2x256xf32>
      %c0_51 = arith.constant 0 : index
      %c17 = arith.constant 17 : index
      %131 = vector.load %arg3[%c0_51, %c17] : memref<2x49xf32, #tpu.memory_space<vmem>>, vector<2x1xf32>
      %132 = vector.broadcast %131 : vector<2x1xf32> to vector<2x256xf32>
      %133 = arith.mulf %132, %118 : vector<2x256xf32>
      %134 = arith.addf %96, %133 : vector<2x256xf32>
      %c0_52 = arith.constant 0 : index
      %c18 = arith.constant 18 : index
      %135 = vector.load %arg3[%c0_52, %c18] : memref<2x49xf32, #tpu.memory_space<vmem>>, vector<2x1xf32>
      %136 = vector.broadcast %135 : vector<2x1xf32> to vector<2x256xf32>
      %137 = arith.mulf %136, %118 : vector<2x256xf32>
      %138 = arith.addf %100, %137 : vector<2x256xf32>
      %c0_53 = arith.constant 0 : index
      %c19 = arith.constant 19 : index
      %139 = vector.load %arg3[%c0_53, %c19] : memref<2x49xf32, #tpu.memory_space<vmem>>, vector<2x1xf32>
      %140 = vector.broadcast %139 : vector<2x1xf32> to vector<2x256xf32>
      %141 = arith.mulf %140, %118 : vector<2x256xf32>
      %142 = arith.addf %104, %141 : vector<2x256xf32>
      %c0_54 = arith.constant 0 : index
      %c20 = arith.constant 20 : index
      %143 = vector.load %arg3[%c0_54, %c20] : memref<2x49xf32, #tpu.memory_space<vmem>>, vector<2x1xf32>
      %144 = vector.broadcast %143 : vector<2x1xf32> to vector<2x256xf32>
      %145 = arith.mulf %144, %118 : vector<2x256xf32>
      %146 = arith.addf %108, %145 : vector<2x256xf32>
      %c0_i32_55 = arith.constant 0 : i32
      %147 = vector.broadcast %c0_i32_55 : i32 to vector<1x256xi32>
      %148 = arith.cmpi sge, %24, %147 : vector<1x256xi32>
      %c16_i32_56 = arith.constant 16 : i32
      %149 = vector.broadcast %c16_i32_56 : i32 to vector<1x256xi32>
      %150 = arith.cmpi slt, %24, %149 : vector<1x256xi32>
      %151 = arith.andi %148, %150 : vector<1x256xi1>
      %cst_57 = arith.constant 0.000000e+00 : f32
      %152 = vector.shape_cast %151 : vector<1x256xi1> to vector<1x256xi1>
      %153 = vector.broadcast %152 : vector<1x256xi1> to vector<2x256xi1>
      %154 = vector.broadcast %cst_57 : f32 to vector<2x256xf32>
      %155 = arith.select %153, %23, %154 : vector<2x256xi1>, vector<2x256xf32>
      %c0_58 = arith.constant 0 : index
      %c21 = arith.constant 21 : index
      %156 = vector.load %arg3[%c0_58, %c21] : memref<2x49xf32, #tpu.memory_space<vmem>>, vector<2x1xf32>
      %157 = vector.broadcast %156 : vector<2x1xf32> to vector<2x256xf32>
      %158 = arith.mulf %157, %155 : vector<2x256xf32>
      %159 = arith.addf %122, %158 : vector<2x256xf32>
      %c0_59 = arith.constant 0 : index
      %c22 = arith.constant 22 : index
      %160 = vector.load %arg3[%c0_59, %c22] : memref<2x49xf32, #tpu.memory_space<vmem>>, vector<2x1xf32>
      %161 = vector.broadcast %160 : vector<2x1xf32> to vector<2x256xf32>
      %162 = arith.mulf %161, %155 : vector<2x256xf32>
      %163 = arith.addf %126, %162 : vector<2x256xf32>
      %c0_60 = arith.constant 0 : index
      %c23 = arith.constant 23 : index
      %164 = vector.load %arg3[%c0_60, %c23] : memref<2x49xf32, #tpu.memory_space<vmem>>, vector<2x1xf32>
      %165 = vector.broadcast %164 : vector<2x1xf32> to vector<2x256xf32>
      %166 = arith.mulf %165, %155 : vector<2x256xf32>
      %167 = arith.addf %130, %166 : vector<2x256xf32>
      %c0_61 = arith.constant 0 : index
      %c24 = arith.constant 24 : index
      %168 = vector.load %arg3[%c0_61, %c24] : memref<2x49xf32, #tpu.memory_space<vmem>>, vector<2x1xf32>
      %169 = vector.broadcast %168 : vector<2x1xf32> to vector<2x256xf32>
      %170 = arith.mulf %169, %155 : vector<2x256xf32>
      %171 = arith.addf %134, %170 : vector<2x256xf32>
      %c0_62 = arith.constant 0 : index
      %c25 = arith.constant 25 : index
      %172 = vector.load %arg3[%c0_62, %c25] : memref<2x49xf32, #tpu.memory_space<vmem>>, vector<2x1xf32>
      %173 = vector.broadcast %172 : vector<2x1xf32> to vector<2x256xf32>
      %174 = arith.mulf %173, %155 : vector<2x256xf32>
      %175 = arith.addf %138, %174 : vector<2x256xf32>
      %c0_63 = arith.constant 0 : index
      %c26 = arith.constant 26 : index
      %176 = vector.load %arg3[%c0_63, %c26] : memref<2x49xf32, #tpu.memory_space<vmem>>, vector<2x1xf32>
      %177 = vector.broadcast %176 : vector<2x1xf32> to vector<2x256xf32>
      %178 = arith.mulf %177, %155 : vector<2x256xf32>
      %179 = arith.addf %142, %178 : vector<2x256xf32>
      %c0_64 = arith.constant 0 : index
      %c27 = arith.constant 27 : index
      %180 = vector.load %arg3[%c0_64, %c27] : memref<2x49xf32, #tpu.memory_space<vmem>>, vector<2x1xf32>
      %181 = vector.broadcast %180 : vector<2x1xf32> to vector<2x256xf32>
      %182 = arith.mulf %181, %155 : vector<2x256xf32>
      %183 = arith.addf %146, %182 : vector<2x256xf32>
      %c240_i32 = arith.constant 240 : i32
      %184 = tpu.dynamic_rotate %23 by %c240_i32 dim 1 : vector<2x256xf32>, i32 -> vector<2x256xf32>
      %c-1_i32 = arith.constant -1 : i32
      %185 = vector.broadcast %c-1_i32 : i32 to vector<1x256xi32>
      %186 = arith.cmpi sge, %24, %185 : vector<1x256xi32>
      %c15_i32 = arith.constant 15 : i32
      %187 = vector.broadcast %c15_i32 : i32 to vector<1x256xi32>
      %188 = arith.cmpi slt, %24, %187 : vector<1x256xi32>
      %189 = arith.andi %186, %188 : vector<1x256xi1>
      %cst_65 = arith.constant 0.000000e+00 : f32
      %190 = vector.shape_cast %189 : vector<1x256xi1> to vector<1x256xi1>
      %191 = vector.broadcast %190 : vector<1x256xi1> to vector<2x256xi1>
      %192 = vector.broadcast %cst_65 : f32 to vector<2x256xf32>
      %193 = arith.select %191, %184, %192 : vector<2x256xi1>, vector<2x256xf32>
      %c0_66 = arith.constant 0 : index
      %c28 = arith.constant 28 : index
      %194 = vector.load %arg3[%c0_66, %c28] : memref<2x49xf32, #tpu.memory_space<vmem>>, vector<2x1xf32>
      %195 = vector.broadcast %194 : vector<2x1xf32> to vector<2x256xf32>
      %196 = arith.mulf %195, %193 : vector<2x256xf32>
      %197 = arith.addf %159, %196 : vector<2x256xf32>
      %c0_67 = arith.constant 0 : index
      %c29 = arith.constant 29 : index
      %198 = vector.load %arg3[%c0_67, %c29] : memref<2x49xf32, #tpu.memory_space<vmem>>, vector<2x1xf32>
      %199 = vector.broadcast %198 : vector<2x1xf32> to vector<2x256xf32>
      %200 = arith.mulf %199, %193 : vector<2x256xf32>
      %201 = arith.addf %163, %200 : vector<2x256xf32>
      %c0_68 = arith.constant 0 : index
      %c30 = arith.constant 30 : index
      %202 = vector.load %arg3[%c0_68, %c30] : memref<2x49xf32, #tpu.memory_space<vmem>>, vector<2x1xf32>
      %203 = vector.broadcast %202 : vector<2x1xf32> to vector<2x256xf32>
      %204 = arith.mulf %203, %193 : vector<2x256xf32>
      %205 = arith.addf %167, %204 : vector<2x256xf32>
      %c0_69 = arith.constant 0 : index
      %c31 = arith.constant 31 : index
      %206 = vector.load %arg3[%c0_69, %c31] : memref<2x49xf32, #tpu.memory_space<vmem>>, vector<2x1xf32>
      %207 = vector.broadcast %206 : vector<2x1xf32> to vector<2x256xf32>
      %208 = arith.mulf %207, %193 : vector<2x256xf32>
      %209 = arith.addf %171, %208 : vector<2x256xf32>
      %c0_70 = arith.constant 0 : index
      %c32 = arith.constant 32 : index
      %210 = vector.load %arg3[%c0_70, %c32] : memref<2x49xf32, #tpu.memory_space<vmem>>, vector<2x1xf32>
      %211 = vector.broadcast %210 : vector<2x1xf32> to vector<2x256xf32>
      %212 = arith.mulf %211, %193 : vector<2x256xf32>
      %213 = arith.addf %175, %212 : vector<2x256xf32>
      %c0_71 = arith.constant 0 : index
      %c33 = arith.constant 33 : index
      %214 = vector.load %arg3[%c0_71, %c33] : memref<2x49xf32, #tpu.memory_space<vmem>>, vector<2x1xf32>
      %215 = vector.broadcast %214 : vector<2x1xf32> to vector<2x256xf32>
      %216 = arith.mulf %215, %193 : vector<2x256xf32>
      %217 = arith.addf %179, %216 : vector<2x256xf32>
      %c0_72 = arith.constant 0 : index
      %c34 = arith.constant 34 : index
      %218 = vector.load %arg3[%c0_72, %c34] : memref<2x49xf32, #tpu.memory_space<vmem>>, vector<2x1xf32>
      %219 = vector.broadcast %218 : vector<2x1xf32> to vector<2x256xf32>
      %220 = arith.mulf %219, %193 : vector<2x256xf32>
      %221 = arith.addf %183, %220 : vector<2x256xf32>
      %c224_i32 = arith.constant 224 : i32
      %222 = tpu.dynamic_rotate %23 by %c224_i32 dim 1 : vector<2x256xf32>, i32 -> vector<2x256xf32>
      %c-2_i32 = arith.constant -2 : i32
      %223 = vector.broadcast %c-2_i32 : i32 to vector<1x256xi32>
      %224 = arith.cmpi sge, %24, %223 : vector<1x256xi32>
      %c14_i32 = arith.constant 14 : i32
      %225 = vector.broadcast %c14_i32 : i32 to vector<1x256xi32>
      %226 = arith.cmpi slt, %24, %225 : vector<1x256xi32>
      %227 = arith.andi %224, %226 : vector<1x256xi1>
      %cst_73 = arith.constant 0.000000e+00 : f32
      %228 = vector.shape_cast %227 : vector<1x256xi1> to vector<1x256xi1>
      %229 = vector.broadcast %228 : vector<1x256xi1> to vector<2x256xi1>
      %230 = vector.broadcast %cst_73 : f32 to vector<2x256xf32>
      %231 = arith.select %229, %222, %230 : vector<2x256xi1>, vector<2x256xf32>
      %c0_74 = arith.constant 0 : index
      %c35 = arith.constant 35 : index
      %232 = vector.load %arg3[%c0_74, %c35] : memref<2x49xf32, #tpu.memory_space<vmem>>, vector<2x1xf32>
      %233 = vector.broadcast %232 : vector<2x1xf32> to vector<2x256xf32>
      %234 = arith.mulf %233, %231 : vector<2x256xf32>
      %235 = arith.addf %197, %234 : vector<2x256xf32>
      %c0_75 = arith.constant 0 : index
      %c36 = arith.constant 36 : index
      %236 = vector.load %arg3[%c0_75, %c36] : memref<2x49xf32, #tpu.memory_space<vmem>>, vector<2x1xf32>
      %237 = vector.broadcast %236 : vector<2x1xf32> to vector<2x256xf32>
      %238 = arith.mulf %237, %231 : vector<2x256xf32>
      %239 = arith.addf %201, %238 : vector<2x256xf32>
      %c0_76 = arith.constant 0 : index
      %c37 = arith.constant 37 : index
      %240 = vector.load %arg3[%c0_76, %c37] : memref<2x49xf32, #tpu.memory_space<vmem>>, vector<2x1xf32>
      %241 = vector.broadcast %240 : vector<2x1xf32> to vector<2x256xf32>
      %242 = arith.mulf %241, %231 : vector<2x256xf32>
      %243 = arith.addf %205, %242 : vector<2x256xf32>
      %c0_77 = arith.constant 0 : index
      %c38 = arith.constant 38 : index
      %244 = vector.load %arg3[%c0_77, %c38] : memref<2x49xf32, #tpu.memory_space<vmem>>, vector<2x1xf32>
      %245 = vector.broadcast %244 : vector<2x1xf32> to vector<2x256xf32>
      %246 = arith.mulf %245, %231 : vector<2x256xf32>
      %247 = arith.addf %209, %246 : vector<2x256xf32>
      %c0_78 = arith.constant 0 : index
      %c39 = arith.constant 39 : index
      %248 = vector.load %arg3[%c0_78, %c39] : memref<2x49xf32, #tpu.memory_space<vmem>>, vector<2x1xf32>
      %249 = vector.broadcast %248 : vector<2x1xf32> to vector<2x256xf32>
      %250 = arith.mulf %249, %231 : vector<2x256xf32>
      %251 = arith.addf %213, %250 : vector<2x256xf32>
      %c0_79 = arith.constant 0 : index
      %c40 = arith.constant 40 : index
      %252 = vector.load %arg3[%c0_79, %c40] : memref<2x49xf32, #tpu.memory_space<vmem>>, vector<2x1xf32>
      %253 = vector.broadcast %252 : vector<2x1xf32> to vector<2x256xf32>
      %254 = arith.mulf %253, %231 : vector<2x256xf32>
      %255 = arith.addf %217, %254 : vector<2x256xf32>
      %c0_80 = arith.constant 0 : index
      %c41 = arith.constant 41 : index
      %256 = vector.load %arg3[%c0_80, %c41] : memref<2x49xf32, #tpu.memory_space<vmem>>, vector<2x1xf32>
      %257 = vector.broadcast %256 : vector<2x1xf32> to vector<2x256xf32>
      %258 = arith.mulf %257, %231 : vector<2x256xf32>
      %259 = arith.addf %221, %258 : vector<2x256xf32>
      %c208_i32 = arith.constant 208 : i32
      %260 = tpu.dynamic_rotate %23 by %c208_i32 dim 1 : vector<2x256xf32>, i32 -> vector<2x256xf32>
      %c-3_i32 = arith.constant -3 : i32
      %261 = vector.broadcast %c-3_i32 : i32 to vector<1x256xi32>
      %262 = arith.cmpi sge, %24, %261 : vector<1x256xi32>
      %c13_i32 = arith.constant 13 : i32
      %263 = vector.broadcast %c13_i32 : i32 to vector<1x256xi32>
      %264 = arith.cmpi slt, %24, %263 : vector<1x256xi32>
      %265 = arith.andi %262, %264 : vector<1x256xi1>
      %cst_81 = arith.constant 0.000000e+00 : f32
      %266 = vector.shape_cast %265 : vector<1x256xi1> to vector<1x256xi1>
      %267 = vector.broadcast %266 : vector<1x256xi1> to vector<2x256xi1>
      %268 = vector.broadcast %cst_81 : f32 to vector<2x256xf32>
      %269 = arith.select %267, %260, %268 : vector<2x256xi1>, vector<2x256xf32>
      %c0_82 = arith.constant 0 : index
      %c42 = arith.constant 42 : index
      %270 = vector.load %arg3[%c0_82, %c42] : memref<2x49xf32, #tpu.memory_space<vmem>>, vector<2x1xf32>
      %271 = vector.broadcast %270 : vector<2x1xf32> to vector<2x256xf32>
      %272 = arith.mulf %271, %269 : vector<2x256xf32>
      %273 = arith.addf %235, %272 : vector<2x256xf32>
      %c0_83 = arith.constant 0 : index
      %c43 = arith.constant 43 : index
      %274 = vector.load %arg3[%c0_83, %c43] : memref<2x49xf32, #tpu.memory_space<vmem>>, vector<2x1xf32>
      %275 = vector.broadcast %274 : vector<2x1xf32> to vector<2x256xf32>
      %276 = arith.mulf %275, %269 : vector<2x256xf32>
      %277 = arith.addf %239, %276 : vector<2x256xf32>
      %c0_84 = arith.constant 0 : index
      %c44 = arith.constant 44 : index
      %278 = vector.load %arg3[%c0_84, %c44] : memref<2x49xf32, #tpu.memory_space<vmem>>, vector<2x1xf32>
      %279 = vector.broadcast %278 : vector<2x1xf32> to vector<2x256xf32>
      %280 = arith.mulf %279, %269 : vector<2x256xf32>
      %281 = arith.addf %243, %280 : vector<2x256xf32>
      %c0_85 = arith.constant 0 : index
      %c45 = arith.constant 45 : index
      %282 = vector.load %arg3[%c0_85, %c45] : memref<2x49xf32, #tpu.memory_space<vmem>>, vector<2x1xf32>
      %283 = vector.broadcast %282 : vector<2x1xf32> to vector<2x256xf32>
      %284 = arith.mulf %283, %269 : vector<2x256xf32>
      %285 = arith.addf %247, %284 : vector<2x256xf32>
      %c0_86 = arith.constant 0 : index
      %c46 = arith.constant 46 : index
      %286 = vector.load %arg3[%c0_86, %c46] : memref<2x49xf32, #tpu.memory_space<vmem>>, vector<2x1xf32>
      %287 = vector.broadcast %286 : vector<2x1xf32> to vector<2x256xf32>
      %288 = arith.mulf %287, %269 : vector<2x256xf32>
      %289 = arith.addf %251, %288 : vector<2x256xf32>
      %c0_87 = arith.constant 0 : index
      %c47 = arith.constant 47 : index
      %290 = vector.load %arg3[%c0_87, %c47] : memref<2x49xf32, #tpu.memory_space<vmem>>, vector<2x1xf32>
      %291 = vector.broadcast %290 : vector<2x1xf32> to vector<2x256xf32>
      %292 = arith.mulf %291, %269 : vector<2x256xf32>
      %293 = arith.addf %255, %292 : vector<2x256xf32>
      %c0_88 = arith.constant 0 : index
      %c48 = arith.constant 48 : index
      %294 = vector.load %arg3[%c0_88, %c48] : memref<2x49xf32, #tpu.memory_space<vmem>>, vector<2x1xf32>
      %295 = vector.broadcast %294 : vector<2x1xf32> to vector<2x256xf32>
      %296 = arith.mulf %295, %269 : vector<2x256xf32>
      %297 = arith.addf %259, %296 : vector<2x256xf32>
      %cst_89 = arith.constant 0.000000e+00 : f32
      %298 = vector.broadcast %cst_89 : f32 to vector<2x256xf32>
      %c3_i32_90 = arith.constant 3 : i32
      %299 = tpu.dynamic_rotate %273 by %c3_i32_90 dim 1 : vector<2x256xf32>, i32 -> vector<2x256xf32>
      %c3_i32_91 = arith.constant 3 : i32
      %300 = vector.broadcast %c3_i32_91 : i32 to vector<1x256xi32>
      %301 = arith.cmpi sge, %25, %300 : vector<1x256xi32>
      %c19_i32_92 = arith.constant 19 : i32
      %302 = vector.broadcast %c19_i32_92 : i32 to vector<1x256xi32>
      %303 = arith.cmpi slt, %25, %302 : vector<1x256xi32>
      %304 = arith.andi %301, %303 : vector<1x256xi1>
      %cst_93 = arith.constant 0.000000e+00 : f32
      %305 = vector.shape_cast %304 : vector<1x256xi1> to vector<1x256xi1>
      %306 = vector.broadcast %305 : vector<1x256xi1> to vector<2x256xi1>
      %307 = vector.broadcast %cst_93 : f32 to vector<2x256xf32>
      %308 = arith.select %306, %299, %307 : vector<2x256xi1>, vector<2x256xf32>
      %309 = arith.addf %298, %308 : vector<2x256xf32>
      %c2_i32_94 = arith.constant 2 : i32
      %310 = tpu.dynamic_rotate %277 by %c2_i32_94 dim 1 : vector<2x256xf32>, i32 -> vector<2x256xf32>
      %c2_i32_95 = arith.constant 2 : i32
      %311 = vector.broadcast %c2_i32_95 : i32 to vector<1x256xi32>
      %312 = arith.cmpi sge, %25, %311 : vector<1x256xi32>
      %c18_i32_96 = arith.constant 18 : i32
      %313 = vector.broadcast %c18_i32_96 : i32 to vector<1x256xi32>
      %314 = arith.cmpi slt, %25, %313 : vector<1x256xi32>
      %315 = arith.andi %312, %314 : vector<1x256xi1>
      %cst_97 = arith.constant 0.000000e+00 : f32
      %316 = vector.shape_cast %315 : vector<1x256xi1> to vector<1x256xi1>
      %317 = vector.broadcast %316 : vector<1x256xi1> to vector<2x256xi1>
      %318 = vector.broadcast %cst_97 : f32 to vector<2x256xf32>
      %319 = arith.select %317, %310, %318 : vector<2x256xi1>, vector<2x256xf32>
      %320 = arith.addf %309, %319 : vector<2x256xf32>
      %c1_i32_98 = arith.constant 1 : i32
      %321 = tpu.dynamic_rotate %281 by %c1_i32_98 dim 1 : vector<2x256xf32>, i32 -> vector<2x256xf32>
      %c1_i32_99 = arith.constant 1 : i32
      %322 = vector.broadcast %c1_i32_99 : i32 to vector<1x256xi32>
      %323 = arith.cmpi sge, %25, %322 : vector<1x256xi32>
      %c17_i32_100 = arith.constant 17 : i32
      %324 = vector.broadcast %c17_i32_100 : i32 to vector<1x256xi32>
      %325 = arith.cmpi slt, %25, %324 : vector<1x256xi32>
      %326 = arith.andi %323, %325 : vector<1x256xi1>
      %cst_101 = arith.constant 0.000000e+00 : f32
      %327 = vector.shape_cast %326 : vector<1x256xi1> to vector<1x256xi1>
      %328 = vector.broadcast %327 : vector<1x256xi1> to vector<2x256xi1>
      %329 = vector.broadcast %cst_101 : f32 to vector<2x256xf32>
      %330 = arith.select %328, %321, %329 : vector<2x256xi1>, vector<2x256xf32>
      %331 = arith.addf %320, %330 : vector<2x256xf32>
      %c0_i32_102 = arith.constant 0 : i32
      %332 = vector.broadcast %c0_i32_102 : i32 to vector<1x256xi32>
      %333 = arith.cmpi sge, %25, %332 : vector<1x256xi32>
      %c16_i32_103 = arith.constant 16 : i32
      %334 = vector.broadcast %c16_i32_103 : i32 to vector<1x256xi32>
      %335 = arith.cmpi slt, %25, %334 : vector<1x256xi32>
      %336 = arith.andi %333, %335 : vector<1x256xi1>
      %cst_104 = arith.constant 0.000000e+00 : f32
      %337 = vector.shape_cast %336 : vector<1x256xi1> to vector<1x256xi1>
      %338 = vector.broadcast %337 : vector<1x256xi1> to vector<2x256xi1>
      %339 = vector.broadcast %cst_104 : f32 to vector<2x256xf32>
      %340 = arith.select %338, %285, %339 : vector<2x256xi1>, vector<2x256xf32>
      %341 = arith.addf %331, %340 : vector<2x256xf32>
      %c255_i32 = arith.constant 255 : i32
      %342 = tpu.dynamic_rotate %289 by %c255_i32 dim 1 : vector<2x256xf32>, i32 -> vector<2x256xf32>
      %c-1_i32_105 = arith.constant -1 : i32
      %343 = vector.broadcast %c-1_i32_105 : i32 to vector<1x256xi32>
      %344 = arith.cmpi sge, %25, %343 : vector<1x256xi32>
      %c15_i32_106 = arith.constant 15 : i32
      %345 = vector.broadcast %c15_i32_106 : i32 to vector<1x256xi32>
      %346 = arith.cmpi slt, %25, %345 : vector<1x256xi32>
      %347 = arith.andi %344, %346 : vector<1x256xi1>
      %cst_107 = arith.constant 0.000000e+00 : f32
      %348 = vector.shape_cast %347 : vector<1x256xi1> to vector<1x256xi1>
      %349 = vector.broadcast %348 : vector<1x256xi1> to vector<2x256xi1>
      %350 = vector.broadcast %cst_107 : f32 to vector<2x256xf32>
      %351 = arith.select %349, %342, %350 : vector<2x256xi1>, vector<2x256xf32>
      %352 = arith.addf %341, %351 : vector<2x256xf32>
      %c254_i32 = arith.constant 254 : i32
      %353 = tpu.dynamic_rotate %293 by %c254_i32 dim 1 : vector<2x256xf32>, i32 -> vector<2x256xf32>
      %c-2_i32_108 = arith.constant -2 : i32
      %354 = vector.broadcast %c-2_i32_108 : i32 to vector<1x256xi32>
      %355 = arith.cmpi sge, %25, %354 : vector<1x256xi32>
      %c14_i32_109 = arith.constant 14 : i32
      %356 = vector.broadcast %c14_i32_109 : i32 to vector<1x256xi32>
      %357 = arith.cmpi slt, %25, %356 : vector<1x256xi32>
      %358 = arith.andi %355, %357 : vector<1x256xi1>
      %cst_110 = arith.constant 0.000000e+00 : f32
      %359 = vector.shape_cast %358 : vector<1x256xi1> to vector<1x256xi1>
      %360 = vector.broadcast %359 : vector<1x256xi1> to vector<2x256xi1>
      %361 = vector.broadcast %cst_110 : f32 to vector<2x256xf32>
      %362 = arith.select %360, %353, %361 : vector<2x256xi1>, vector<2x256xf32>
      %363 = arith.addf %352, %362 : vector<2x256xf32>
      %c253_i32 = arith.constant 253 : i32
      %364 = tpu.dynamic_rotate %297 by %c253_i32 dim 1 : vector<2x256xf32>, i32 -> vector<2x256xf32>
      %c-3_i32_111 = arith.constant -3 : i32
      %365 = vector.broadcast %c-3_i32_111 : i32 to vector<1x256xi32>
      %366 = arith.cmpi sge, %25, %365 : vector<1x256xi32>
      %c13_i32_112 = arith.constant 13 : i32
      %367 = vector.broadcast %c13_i32_112 : i32 to vector<1x256xi32>
      %368 = arith.cmpi slt, %25, %367 : vector<1x256xi32>
      %369 = arith.andi %366, %368 : vector<1x256xi1>
      %cst_113 = arith.constant 0.000000e+00 : f32
      %370 = vector.shape_cast %369 : vector<1x256xi1> to vector<1x256xi1>
      %371 = vector.broadcast %370 : vector<1x256xi1> to vector<2x256xi1>
      %372 = vector.broadcast %cst_113 : f32 to vector<2x256xf32>
      %373 = arith.select %371, %364, %372 : vector<2x256xi1>, vector<2x256xf32>
      %374 = arith.addf %363, %373 : vector<2x256xf32>
      %cst_114 = arith.constant dense<0.000000e+00> : vector<256xf32>
      %375 = vector.multi_reduction <add>, %374, %cst_114 [0] : vector<2x256xf32> to vector<256xf32>
      %376 = vector.shape_cast %375 : vector<256xf32> to vector<1x256xf32>
      %377 = arith.negf %376 : vector<1x256xf32>
      %378 = math.exp %377 : vector<1x256xf32>
      %cst_115 = arith.constant 1.000000e+00 : f32
      %379 = vector.broadcast %cst_115 : f32 to vector<1x256xf32>
      %380 = arith.addf %379, %378 : vector<1x256xf32>
      %381 = arith.divf %379, %380 : vector<1x256xf32>
      %c0_116 = arith.constant 0 : index
      %c0_117 = arith.constant 0 : index
      %c0_118 = arith.constant 0 : index
      %382 = vector.load %arg5[%c0_116, %c0_117, %c0_118] : memref<1x1x256xf32, #tpu.memory_space<vmem>>, vector<1x1x256xf32>
      %383 = vector.shape_cast %382 : vector<1x1x256xf32> to vector<1x256xf32>
      %384 = vector.shape_cast %381 : vector<1x256xf32> to vector<1x1x256xf32>
      tpu.vector_store %arg5[%c0_116, %c0_117, %c0_118], %384 {strides = array<i32>} : memref<1x1x256xf32, #tpu.memory_space<vmem>>, vector<1x1x256xf32>,
    } else {
    }
    return
  }
  func.func @transform_0(%arg0: i32, %arg1: i32) -> (i32, i32, i32) {
    %c0_i32 = arith.constant 0 : i32
    %c0_i32_0 = arith.constant 0 : i32
    return %arg0, %arg1, %c0_i32 : i32, i32, i32
  }
  func.func @transform_1(%arg0: i32, %arg1: i32) -> (i32, i32) {
    %c0_i32 = arith.constant 0 : i32
    %c0_i32_0 = arith.constant 0 : i32
    %c0_i32_1 = arith.constant 0 : i32
    return %c0_i32, %c0_i32_0 : i32, i32
  }
  func.func @transform_2(%arg0: i32, %arg1: i32) -> (i32, i32) {
    %c0_i32 = arith.constant 0 : i32
    %c0_i32_0 = arith.constant 0 : i32
    %c0_i32_1 = arith.constant 0 : i32
    return %c0_i32, %c0_i32_0 : i32, i32
  }
  func.func @transform_3(%arg0: i32, %arg1: i32) -> (i32, i32, i32) {
    %c0_i32 = arith.constant 0 : i32
    %c0_i32_0 = arith.constant 0 : i32
    %c0_i32_1 = arith.constant 0 : i32
    return %arg0, %c0_i32, %c0_i32_0 : i32, i32, i32
  }
}

</mosaic_0001>

<bundles_post_ra>
// kernel: tpu_custom_call.1
= control target key start
LH: loop header
LB: loop body
LE: loop exit
PB: predicated region body
PF: predicated region fallthrough
CT: control target
= control target key end

     0   :  { %8 = vsyncpa [#allocation5], 0  ;;  %s2204_s0 = inlined_call_operand.hbm [shape: f32[2,4,256], index: 0, kind: input, shape index: {}]   ;;  %s2205_s1 = inlined_call_operand.hbm [shape: f32[2,49], index: 1, kind: input, shape index: {}]   ;;  %s2206_s2 = inlined_call_operand.hbm [shape: s32[2,256], index: 2, kind: input, shape index: {}]   ;;  %s2207_s3 = inlined_call_operand.hbm [shape: f32[2,1,256], index: 3, kind: output, shape index: {}]  }
   0x1   :  { %10 = vsyncpa [#allocation5 + $0x1], 0 }
   0x2   :  { %11 = vsyncpa [#allocation8], 0 }
   0x3   :  { %12 = vsyncpa [#allocation6], 0 }
   0x4   :  { %14 = vsyncpa [#allocation6 + $0x1], 0  ;;  %s1599_s12 = smov 0   ;;  %s1601_s13 = smov 0  }
   0x5   :  { %s1603_s14 = smov 0   ;;  %s1605_s15 = smov 0  }
   0x6   :  { %s1607_s16 = smov 0   ;;  %s1609_s17 = smov 0  }
   0x7 LB: > { %s1115_s18 = sadd.s32 4294967295, %s1514_s17   ;;  %s1116_s19 = sadd.s32 4294967294, %s1514_s17   ;;  %s1514_s17 = sphi %s1609_s17, %s20_s17   ;;  %s1510_s16 = sphi %s1607_s16, %s2245_s16   ;;  %s1506_s15 = sphi %s1605_s15, %s2244_s15   ;;  %s1502_s14 = sphi %s1603_s14, %s2243_s14   ;;  %s1498_s13 = sphi %s1601_s13, %s2242_s13   ;;  %s1494_s12 = sphi %s1599_s12, %s2241_s12  }
   0x8   : > { %p54_p0 = scmp.ne.s32.totalorder %s1498_s13, %s1494_s12  ;;  %p1633_p1 = scmp.eq.s32.totalorder %s1115_s18, 0 }
   0x9   : > { %p126_p2 = scmp.eq.s32.totalorder %s1116_s19, 1  ;;  %p1117_p4 = scmp.ge.s32.totalorder %s1514_s17, 1 }
   0xa   : > { %p1639_p3 = por %p1633_p1, %p54_p0  ;;  %p133_p6 = scmp.lt.s32.totalorder %s1514_s17, 3 }
   0xb   : > { %p1644_p5 = por %p126_p2, %p54_p0  ;;  %s145_s25 = sshll.u32 %s2205_s1, 4  ;;  %s146_s25 = int_to_ptr.hbm [resolvable:$true] %s145_s25 }
   0xc   : > { %p1652_p7 = pnand %p1117_p4, %p133_p6  ;;  %p1120_p8 = scmp.ge.s32.totalorder %s1514_s17, 2 }
   0xd   : > { %s1516_s27 = smov [#allocation7]   ;;  %s157_s4 = sshll.u32 %s2206_s2, 4  ;;  %s158_s4 = int_to_ptr.hbm [resolvable:$true] %s157_s4 }
   0xe   : > { %p1148_p9 = pneg %p1652_p7  ;;  %s147_s28 = sshll.u32 %s1516_s27, 4  ;;  %s148_s28 = int_to_ptr.vmem [resolvable:$true] %s147_s28 }
   0xf   : > { %s1517_s5 = smov [#allocation9]   ;;  %p120_p11 = scmp.eq.s32.totalorder %s1115_s18, 1 }
  0x10   : > { %p1149_p10 = pnand %p1148_p9, %p1633_p1  ;;  %s159_s6 = sshll.u32 %s1517_s5, 4  ;;  %s160_s6 = int_to_ptr.vmem [resolvable:$true] %s159_s6 }
  0x11   : > { %s32_s7 = sadd.s32 1, %s1510_s16  ;;  %s41_s8 = sadd.s32 1, %s1502_s14 }
  0x12   : > { %1151 = dma.hbm_to_vmem [thread:$0]  (!%p1149_p10), %s146_s25, 32, %s148_s28, [#allocation8]  }
  0x13   : > { %1154 = dma.hbm_to_vmem [thread:$0]  (!%p1149_p10), %s158_s4, 64, %s160_s6, [#allocation8]  }
  0x14   : > { %p34_p12 = scmp.ge.s32.totalorder %s32_s7, 2  ;;  %p48_p13 = scmp.ne.s32.totalorder %s1502_s14, %s1498_s13 }
  0x15   : > { %p49_p0 = scmp.eq.s32.totalorder %s1514_s17, 0  ;;  %p1165_p4 = scmp.lt.s32.totalorder %s1514_s17, 2 }
  0x16   : > { %s2247_s7 = smov (%p34_p12, %s32_s7), 0  ;;  %p1671_p2 = por %p120_p11, %p48_p13 }
  0x17   : > { %s36_s10 = ssub.s32 %s1510_s16, %s2247_s7  ;;  %s170_s11 = sand.u32 1, %s1502_s14  }
  0x18   : > { %p39_p6 = scmp.eq.s32.totalorder %s36_s10, 0  ;;  %p50_p9 = por %p49_p0, %p48_p13 }
  0x19   : > { %s1121_s19 = sshll.u32 %s170_s11, 3  ;;  %s1135_s18 = sshll.u32 %s1510_s16, 3 }
  0x1a   : > { %s1681_s23 = scalar_select %p39_p6, %s1502_s14, %s41_s8  }
  0x1b   : > { %s181_s27 = scalar_lea.hbm %s2204_s0, %s1135_s18  ;;  %s174_s29 = scalar_lea.vmem [#allocation4], %s1121_s19 }
  0x1c   : > { %s183_s28 = sshll.u32 %s181_s27, 4  ;;  %s185_s30 = sshll.u32 %s174_s29, 4  ;;  %s184_s28 = int_to_ptr.hbm [resolvable:$true] %s183_s28  ;;  %s186_s30 = int_to_ptr.vmem [resolvable:$true] %s185_s30 }
  0x1d   : > { %p1156_p10 = pnand %p1165_p4, %p50_p9  ;;  %s171_s4 = scalar_lea.sflag [#allocation5], %s170_s11 }
  0x1e   : > { %194 = sbr.rel (%p1652_p7) target bundleno = 524 (0x20c), region = 32  ;;  %s1691_s5 = sand.u32 (!%p1652_p7), 1, %s1498_s13  }
  0x1f   : > { %1158 = dma.hbm_to_vmem [thread:$0]  (!%p1156_p10), %s184_s28, 128, %s186_s30, %s171_s4  }
  0x20   : > { %s1125_s6 = sshll.u32 (!%p1652_p7), %s1691_s5, 3  ;;  %s197_s8 = scalar_lea.sflag (!%p1652_p7), [#allocation5], %s1691_s5 }
  0x21   : > { %s200_s10 = scalar_lea.vmem (!%p1652_p7), [#allocation4], %s1125_s6 }
  0x23   : > { %1481 = dma.done.wait (%p1639_p3), %s197_s8, 128  }
  0x24   : > { %1483 = vsyncadd (%p1639_p3), %s197_s8, 4294967168 }
  0x25   : > { %1485 = dma.done.wait (%p1633_p1), [#allocation8], 96  }
  0x26   : > { %1487 = vsyncadd (%p1633_p1), [#allocation8], 4294967200  ;;  %v1518_v0 = vmov 2   ;;  %v1519_v1 = vmov 0   ;;  %v1520_v2 = vmov 4   ;;  %v245_v4 = vld [vmem:[%s200_s10] sm:$0xff] }
  0x27   : > { %1282 = vset.pattern.permute.xlu2 %v1518_v0  ;;  %1280 = vset.pattern.permute.xlu1 %v1519_v1  ;;  %v1704_v3 = vld [vmem:[#allocation7] sm:$0x3]  ;;  %255 = vst [vmem:[#allocation1] ss:$2 sm:$0xff] %v245_v4  ;;  %vm260_vm0 = vcmask 1043456   ;;  %v1521_v7 = vmov 3  }
  0x28   : > { %1284 = vset.pattern.permute.xlu0 %v1520_v2  ;;  %340 = vperm.xlu2 %1282, %v1704_v3   ;;  %v1522_v8 = vmov 1   ;;  %v1523_v15 = vmov 7   ;;  %v1524_v22 = vmov 6   ;;  %v1525_v23 = vmov 5   ;;  %s1528_s20 = smov 48   ;;  %s1529_s21 = smov 32  }
  0x29   : > { %324 = vperm.xlu1 %1280, %v1704_v3   ;;  %356 = vperm.xlu0 %1284, %v1704_v3   ;;  %v1526_v39 = vmov 9   ;;  %v1527_v40 = vmov 8   ;;  %vm296_vm1 = vcmask 1040384   ;;  %v1530_v46 = vmov 11   ;;  %s1532_s26 = smov 16   ;;  %s1548_s11 = smov 96  }
  0x2a   : > { %v1531_v47 = vmov 10   ;;  %v1533_v48 = vmov 13   ;;  %v1534_v49 = vmov 14   ;;  %v1535_v50 = vmov 12   ;;  %s1552_s19 = smov 112   ;;  %s1563_s18 = smov 80  }
  0x2b   : > { %v1536_v51 = vmov 16   ;;  %v1537_v52 = vmov 15   ;;  %v1538_v53 = vmov 17   ;;  %v1539_v54 = vmov 20   ;;  %s1573_s24 = smov 3   ;;  %s1574_s25 = smov 2  }
  0x2c   : > { %v1540_v55 = vmov 19   ;;  %v1541_v56 = vmov 18   ;;  %v1542_v57 = vmov 25   ;;  %v1543_v58 = vmov 22   ;;  %s1575_s27 = smov 1   ;;  %s1576_s28 = smov 127  }
  0x2d   : > { %v1544_v59 = vmov 21   ;;  %v1545_v60 = vmov 28   ;;  %v1546_v62 = vmov 24   ;;  %v1547_v63 = vmov 23   ;;  %s1577_s29 = smov 125   ;;  %s1578_s30 = smov 126  }
  0x2e   : > { %v256_v5 = vld.sshfl [vmem:[#allocation1] sm:$0xff pattern:$0x75316420]  ;;  %v257_v6 = vld.sshfl [vmem:[#allocation1 + $0x8] sm:$0xff pattern:$0x75316420] }
  0x2f   : > { %v261_v9 = vsel %vm260_vm0, %v256_v5, 0.0  ;;  %277 = vst [vmem:[#allocation1] ss:$2 sm:$0xff] %v245_v4  ;;  %v268_v10 = vsel %vm260_vm0, %v257_v6, 0.0  ;;  %v1549_v2 = vmov 36   ;;  %v1550_v4 = vmov 27  }
  0x30   : > { %1283 = vset.pattern.permute.xlu2 %v1521_v7  ;;  %v262_v11 = vrot.slane %v261_v9, 4  ;;  %v269_v12 = vrot.slane %v268_v10, 4  ;;  %v1551_v5 = vmov 26   ;;  %v1553_v7 = vmov 30   ;;  %s1128_s4 = sshll.u32 %s1691_s5, 1  ;;  %s1132_s6 = sshll.u32 %s1506_s15, 1 }
  0x31   : > { %1281 = vset.pattern.permute.xlu1 %v1522_v8  ;;  %348 = vperm.xlu2 %1283, %v1704_v3   ;;  %v1554_v8 = vmov 29   ;;  %s233_s15 = scalar_lea.vmem [#allocation10], %s1128_s4 }
  0x32   : > { %332 = vperm.xlu1 %1281, %v1704_v3   ;;  %v263_v13 = vadd.f32 %v262_v11, %v261_v9  ;;  %v270_v14 = vadd.f32 %v269_v12, %v268_v10  ;;  %1287 = vset.pattern.permute.xlu0 %v1523_v15  ;;  %v1555_v10 = vmov 43   ;;  %v1557_v15 = vmov 32  }
  0x34   : > { %v264_v16 = vrot.slane %v263_v13, 2  ;;  %v271_v20 = vrot.slane %v270_v14, 2 }
  0x36   : > { %v278_v17 = vld.sshfl [vmem:[#allocation1] sm:$0xff pattern:$0x75316420]  ;;  %v279_v18 = vld.sshfl [vmem:[#allocation1 + $0x8] sm:$0xff pattern:$0x75316420]  ;;  %v265_v24 = vadd.f32 %v264_v16, %v263_v13  ;;  %v272_v29 = vadd.f32 %v271_v20, %v270_v14 }
  0x37   : > { %v282_v19 = vsel %vm260_vm0, %v278_v17, -inf  ;;  %v289_v21 = vsel %vm260_vm0, %v279_v18, -inf  ;;  %v1556_v13 = vmov 40   ;;  %v1558_v16 = vmov 31  }
  0x38   : > { %v283_v25 = vrot.slane %v282_v19, 4  ;;  %v290_v26 = vrot.slane %v289_v21, 4  ;;  %v266_v30 = vrot.slane %v265_v24, 1  ;;  %v273_v35 = vrot.slane %v272_v29, 1 }
  0x39   : > { %1286 = vset.pattern.permute.xlu2 %v1524_v22  ;;  %v1776_v18 = vld [vmem:[#allocation9] ss:$2 sm:$0x3]  ;;  %v1559_v20 = vmov 38   ;;  %v1560_v22 = vmov 35  }
  0x3a   : > { %1285 = vset.pattern.permute.xlu1 %v1525_v23  ;;  %372 = vperm.xlu2 %1286, %v1704_v3   ;;  %v284_v27 = vmax.f32 %v282_v19, %v283_v25  ;;  %v291_v28 = vmax.f32 %v289_v21, %v290_v26  ;;  %v267_v36 = vadd.f32 %v266_v30, %v265_v24  ;;  %vm386_vm2 = vcmp.ge.s32.totalorder %v1776_v18, 2 }
  0x3b   : > { %364 = vperm.xlu1 %1285, %v1704_v3   ;;  %v274_v42 = vadd.f32 %v273_v35, %v272_v29  ;;  %vm387_vm3 = vcmp.lt.s32.totalorder %v1776_v18, 18  ;;  %v1561_v23 = vmov 37   ;;  %vm311_vm5 = vcmp.ge.s32.totalorder %v1776_v18, 3 }
  0x3c   : > { %v285_v31 = vrot.slane %v284_v27, 2  ;;  %v292_v32 = vrot.slane %v291_v28, 2  ;;  %vm388_vm4 = vmand %vm386_vm2, %vm387_vm3  ;;  %vm312_vm6 = vcmp.lt.s32.totalorder %v1776_v18, 19  ;;  %v306_v24 = vlaneseq }
  0x3d   : > { %vm313_vm7 = vmand %vm311_vm5, %vm312_vm6  ;;  %vm459_vm14 = vcmp.ge.s32.totalorder %v1776_v18, 1  ;;  %vm525_vm15 = vcmp.ge.s32.totalorder %v1776_v18, 0  ;;  %vm526_vm0 = vcmp.lt.s32.totalorder %v1776_v18, 16  ;;  %vm460_vm2 = vcmp.lt.s32.totalorder %v1776_v18, 17 }
  0x3e   : > { %v286_v33 = vmax.f32 %v284_v27, %v285_v31  ;;  %v293_v34 = vmax.f32 %v291_v28, %v292_v32  ;;  %v389_v27 = vsel %vm388_vm4, 1, %v1519_v1  ;;  %v1562_v28 = vmov 45   ;;  %vm1847_vm3 = vmand %vm525_vm15, %vm526_vm0 }
  0x3f   : > { %v1793_v29 = vand.u32 127, %v306_v24  ;;  %v390_v31 = vperm.slane %v389_v27, 0  ;;  %v391_v32 = vperm.slane %v389_v27, 1  ;;  %v1567_v27 = vmov 33   ;;  %vm461_vm4 = vmand %vm459_vm14, %vm460_vm2 }
  0x40   : > { %v287_v37 = vrot.slane %v286_v33, 1  ;;  %v294_v38 = vrot.slane %v293_v34, 1  ;;  %vm671_vm14 = vcmp.ge.s32.totalorder %v1776_v18, 4294967294  ;;  %vm672_vm15 = vcmp.lt.s32.totalorder %v1776_v18, 14 }
  0x41   : > { %vm383_vm8 = vcmp.lt.s32.totalorder %v1793_v29, 32  ;;  %vm392_vm9 = vcmp.eq.s32.totalorder %v390_v31, 1  ;;  %vm393_vm10 = vcmp.eq.s32.totalorder %v391_v32, 1  ;;  %vm308_vm11 = vcmp.lt.s32.totalorder %v1793_v29, 48 }
  0x42   : > { %1289 = vset.pattern.permute.xlu2 %v1526_v39  ;;  %v288_v41 = vmax.f32 %v286_v33, %v287_v37  ;;  %v295_v43 = vmax.f32 %v293_v34, %v294_v38  ;;  %v314_v33 = vsel %vm313_vm7, 1, %v1519_v1  ;;  %vm456_vm7 = vcmp.lt.s32.totalorder %v1793_v29, 16 }
  0x43   : > { %1288 = vset.pattern.permute.xlu1 %v1527_v40  ;;  %413 = vperm.xlu2 %1289, %v1704_v3   ;;  %v315_v34 = vperm.slane %v314_v33, 0  ;;  %v316_v35 = vperm.slane %v314_v33, 1  ;;  %v462_v33 = vsel %vm461_vm4, 1, %v1519_v1  ;;  %vm744_vm4 = vcmp.ge.s32.totalorder %v1776_v18, 4294967293 }
  0x44   : > { %405 = vperm.xlu1 %1288, %v1704_v3   ;;  %v1720_v44 = vsel %vm296_vm1, %v267_v36, %v288_v41  ;;  %v1724_v45 = vsel %vm296_vm1, %v274_v42, %v295_v43  ;;  %v1564_v36 = vmov 42  }
  0x45   : > { %302 = vrot.lane.b32.xlu0 %v1720_v44, %s1528_s20  ;;  %vm317_vm12 = vcmp.eq.s32.totalorder %v315_v34, 1  ;;  %vm318_vm13 = vcmp.eq.s32.totalorder %v316_v35, 1 }
  0x4b   : > { %381 = vrot.lane.b32.xlu2 %v1724_v45, %s1529_s21 }
  0x4c   : > { %379 = vrot.lane.b32.xlu1 %v1720_v44, %s1529_s21  ;;  %1291 = vset.pattern.permute.xlu2 %v1530_v46  ;;  %s1012_s21 = sshll.u32 %s233_s15, 4  ;;  %s1013_s21 = int_to_ptr.vmem [resolvable:$true] %s1012_s21 }
  0x4d   : > { %1290 = vset.pattern.permute.xlu1 %v1531_v47  ;;  %304 = vrot.lane.b32.xlu0 %v1724_v45, %s1528_s20  ;;  %s1010_s20 = scalar_lea.hbm %s2207_s3, %s1132_s6 }
  0x53   : > { %429 = vperm.xlu2 %1291, %v1704_v3  }
  0x54   : > { %421 = vperm.xlu1 %1290, %v1704_v3  }
  0x55   : > { %397 = vperm.xlu0 %1287, %v1704_v3  }
  0x5b   : > { %452 = vrot.lane.b32.xlu2 %v1720_v44, %s1532_s26 }
  0x5c   : > { %1293 = vset.pattern.permute.xlu1 %v1533_v48  ;;  %1294 = vset.pattern.permute.xlu2 %v1534_v49 }
  0x5d   : > { %445 = vperm.xlu1 %1293, %v1704_v3   ;;  %1292 = vset.pattern.permute.xlu0 %v1535_v50 }
  0x5e   : > { %437 = vperm.xlu0 %1292, %v1704_v3  }
  0x63   : > { %470 = vperm.xlu2 %1294, %v1704_v3  }
  0x65   : > { %454 = vrot.lane.b32.xlu1 %v1724_v45, %s1532_s26  ;;  %s1014_s26 = sshll.u32 %s1010_s20, 4  ;;  %s1015_s26 = int_to_ptr.hbm [resolvable:$true] %s1014_s26 }
  0x66   : > { %1296 = vset.pattern.permute.xlu1 %v1536_v51  ;;  %1295 = vset.pattern.permute.xlu0 %v1537_v52 }
  0x67   : > { %478 = vperm.xlu0 %1295, %v1704_v3  }
  0x6b   : > { %1297 = vset.pattern.permute.xlu2 %v1538_v53 }
  0x6c   : > { %494 = vperm.xlu2 %1297, %v1704_v3  }
  0x6d   : > { %486 = vperm.xlu1 %1296, %v1704_v3  }
  0x6f   : > { %1300 = vset.pattern.permute.xlu0 %v1539_v54 }
  0x70   : > { %518 = vperm.xlu0 %1300, %v1704_v3  }
  0x74   : > { %1299 = vset.pattern.permute.xlu2 %v1540_v55 }
  0x75   : > { %1298 = vset.pattern.permute.xlu1 %v1541_v56  ;;  %510 = vperm.xlu2 %1299, %v1704_v3  }
  0x76   : > { %502 = vperm.xlu1 %1298, %v1704_v3  }
  0x78   : > { %1305 = vset.pattern.permute.xlu0 %v1542_v57 }
  0x79   : > { %568 = vperm.xlu0 %1305, %v1704_v3  }
  0x7d   : > { %1302 = vset.pattern.permute.xlu2 %v1543_v58 }
  0x7e   : > { %1301 = vset.pattern.permute.xlu1 %v1544_v59  ;;  %544 = vperm.xlu2 %1302, %v1704_v3  }
  0x7f   : > { %536 = vperm.xlu1 %1301, %v1704_v3  }
  0x81   : > { %1308 = vset.pattern.permute.xlu0 %v1545_v60 }
  0x82   : > { %v1746_v61 = vpop.permute.xlu2 %340  ;;  %609 = vperm.xlu0 %1308, %v1704_v3  }
  0x86   : > { %1304 = vset.pattern.permute.xlu2 %v1546_v62 }
  0x87   : > { %1303 = vset.pattern.permute.xlu1 %v1547_v63  ;;  %560 = vperm.xlu2 %1304, %v1704_v3  }
  0x88   : > { %552 = vperm.xlu1 %1303, %v1704_v3  }
  0x8a   : > { %664 = vrot.lane.b32.xlu0 %v1720_v44, %s1548_s11 }
  0x8b   : > { %v1753_v0 = vpop.permute.xlu2 %348  ;;  %1314 = vset.pattern.permute.xlu0 %v1549_v2 }
  0x8f   : > { %1307 = vset.pattern.permute.xlu2 %v1550_v4 }
  0x90   : > { %1306 = vset.pattern.permute.xlu1 %v1551_v5  ;;  %584 = vperm.xlu2 %1307, %v1704_v3  }
  0x91   : > { %576 = vperm.xlu1 %1306, %v1704_v3  }
  0x92   : > { %690 = vperm.xlu0 %1314, %v1704_v3  }
  0x94   : > { %v1758_v6 = vpop.permute.xlu2 %372 }
  0x98   : > { %593 = vrot.lane.b32.xlu2 %v1724_v45, %s1552_s19 }
  0x99   : > { %591 = vrot.lane.b32.xlu1 %v1720_v44, %s1552_s19  ;;  %1310 = vset.pattern.permute.xlu2 %v1553_v7  ;;  %s1442_s19 = sshra.s32 %s1015_s26, 4  ;;  %s1443_s19 = int_to_ptr.hbm [resolvable:$true] %s1442_s19 }
  0x9a   : > { %1309 = vset.pattern.permute.xlu1 %v1554_v8  ;;  %1317 = vset.pattern.permute.xlu0 %v1555_v10  ;;  %p1449_p11 = scmp.lt.s32.totalorder %s1443_s19, %s2207_s3 }
  0x9b   : > { %v1762_v9 = vpop.permute.xlu1 %324  ;;  %763 = vperm.xlu0 %1317, %v1704_v3   ;;  %v1778_v21 = vpop.permute.xlu0 %356 }
  0x9d   : > { %v1765_v11 = vpop.permute.xlu2 %413 }
  0xa0   : > { %625 = vperm.xlu2 %1310, %v1704_v3  }
  0xa1   : > { %617 = vperm.xlu1 %1309, %v1704_v3  }
  0xa3   : > { %1322 = vset.pattern.permute.xlu0 %v1556_v13 }
  0xa4   : > { %v1769_v12 = vpop.permute.xlu1 %332  ;;  %722 = vperm.xlu0 %1322, %v1704_v3  }
  0xa5   : > { %v382_v14 = vpop.permute.xlu2 %381 }
  0xa8   : > { %1312 = vset.pattern.permute.xlu2 %v1557_v15 }
  0xa9   : > { %1311 = vset.pattern.permute.xlu1 %v1558_v16  ;;  %641 = vperm.xlu2 %1312, %v1704_v3  }
  0xaa   : > { %633 = vperm.xlu1 %1311, %v1704_v3  }
  0xac   : > { %1327 = vset.pattern.permute.xlu0 %v1559_v20 }
  0xad   : > { %v1774_v17 = vpop.permute.xlu1 %364  ;;  %v430_v19 = vpop.permute.xlu2 %429  ;;  %706 = vperm.xlu0 %1327, %v1704_v3  }
  0xb1   : > { %1313 = vset.pattern.permute.xlu2 %v1560_v22 }
  0xb2   : > { %666 = vrot.lane.b32.xlu1 %v1724_v45, %s1548_s11  ;;  %682 = vperm.xlu2 %1313, %v1704_v3   ;;  %s1000_s11 = scalar_lea.sflag [#allocation6], %s1691_s5 }
  0xb3   : > { %1315 = vset.pattern.permute.xlu1 %v1561_v23 }
  0xb5   : > { %v1788_v26 = vpop.permute.xlu2 %452  ;;  %1328 = vset.pattern.permute.xlu0 %v1562_v28 }
  0xb6   : > { %v406_v25 = vpop.permute.xlu1 %405  ;;  %779 = vperm.xlu0 %1328, %v1704_v3  }
  0xb7   : > { %v303_v30 = vpop.permute.xlu0 %302 }
  0xba   : > { %737 = vrot.lane.b32.xlu1 %v1720_v44, %s1563_s18  ;;  %739 = vrot.lane.b32.xlu2 %v1724_v45, %s1563_s18  ;;  %s1444_s18 = scalar_lea.hbm %s1443_s19, 2 }
  0xbb   : > { %1316 = vset.pattern.permute.xlu2 %v1564_v36  ;;  %p1445_p1 = scmp.ne.s32.totalorder %s1443_s19, %s1444_s18 }
  0xbd   : > { %v1799_v38 = vpop.permute.xlu2 %470  ;;  %p1446_p3 = pnand %p1445_p1, %p1671_p2 }
  0xbe   : > { %v380_v37 = vpop.permute.xlu1 %379 }
  0xbf   : > { %v384_v39 = vsel %vm383_vm8, %v380_v37, %v382_v14  ;;  %v385_v40 = vsel %vm383_vm8, %v382_v14, %v380_v37  ;;  %v305_v43 = vpop.permute.xlu0 %304  ;;  %p1447_p7 = pneg %p1446_p3 }
  0xc0   : > { %v1802_v41 = vsel %vm392_vm9, %v385_v40, 0.0  ;;  %v1804_v42 = vsel %vm393_vm10, %v384_v39, 0.0  ;;  %v309_v50 = vsel %vm308_vm11, %v303_v30, %v305_v43  ;;  %v310_v51 = vsel %vm308_vm11, %v305_v43, %v303_v30 }
  0xc1   : > { %v408_v46 = vmul.f32 %v406_v25, %v1802_v41  ;;  %v409_v47 = vmul.f32 %v406_v25, %v1804_v42  ;;  %v416_v48 = vmul.f32 %v1765_v11, %v1802_v41  ;;  %v417_v49 = vmul.f32 %v1765_v11, %v1804_v42 }
  0xc2   : > { %698 = vperm.xlu1 %1315, %v1704_v3   ;;  %v432_v52 = vmul.f32 %v430_v19, %v1802_v41  ;;  %v433_v53 = vmul.f32 %v430_v19, %v1804_v42  ;;  %v319_v54 = vsel %vm317_vm12, %v310_v51, 0.0  ;;  %v320_v55 = vsel %vm318_vm13, %v309_v50, 0.0  ;;  %755 = vperm.xlu2 %1316, %v1704_v3  }
  0xc3   : > { %v351_v56 = vmul.f32 %v1753_v0, %v319_v54  ;;  %v352_v57 = vmul.f32 %v1753_v0, %v320_v55  ;;  %v335_v59 = vmul.f32 %v1769_v12, %v319_v54  ;;  %v336_v60 = vmul.f32 %v1769_v12, %v320_v55 }
  0xc4   : > { %v343_v62 = vmul.f32 %v1746_v61, %v319_v54  ;;  %v344_v63 = vmul.f32 %v1746_v61, %v320_v55  ;;  %v1565_v11 = vmov 48   ;;  %v359_v15 = vmul.f32 %v1778_v21, %v319_v54 }
  0xc5   : > { %v1830_v5 = vadd.f32 %v408_v46, %v335_v59  ;;  %v1832_v7 = vadd.f32 %v409_v47, %v336_v60  ;;  %1329 = vset.pattern.permute.xlu0 %v1565_v11  ;;  %v360_v16 = vmul.f32 %v1778_v21, %v320_v55  ;;  %v327_v19 = vmul.f32 %v1762_v9, %v319_v54 }
  0xc6   : > { %v422_v58 = vpop.permute.xlu1 %421  ;;  %v1827_v0 = vpop.permute.xlu2 %494  ;;  %v1834_v8 = vadd.f32 %v416_v48, %v343_v62  ;;  %v1836_v10 = vadd.f32 %v417_v49, %v344_v63  ;;  %v328_v20 = vmul.f32 %v1762_v9, %v320_v55  ;;  %v1566_v25 = vmov 44  }
  0xc7   : > { %v424_v2 = vmul.f32 %v422_v58, %v1802_v41  ;;  %v425_v4 = vmul.f32 %v422_v58, %v1804_v42  ;;  %v398_v13 = vpop.permute.xlu0 %397  ;;  %v1858_v28 = vadd.f32 %v432_v52, %v359_v15  ;;  %v1860_v30 = vadd.f32 %v433_v53, %v360_v16 }
  0xc8   : > { %v400_v22 = vmul.f32 %v398_v13, %v1802_v41  ;;  %v401_v23 = vmul.f32 %v398_v13, %v1804_v42  ;;  %v528_v9 = vsel %vm1847_vm3, 1, %v1519_v1  ;;  %v375_v36 = vmul.f32 %v1758_v6, %v319_v54  ;;  %vm673_vm3 = vmand %vm671_vm14, %vm672_vm15 }
  0xc9   : > { %v1839_v61 = vadd.f32 %v424_v2, %v351_v56  ;;  %v1841_v12 = vadd.f32 %v425_v4, %v352_v57  ;;  %v529_v34 = vperm.slane %v528_v9, 0  ;;  %v530_v35 = vperm.slane %v528_v9, 1 }
  0xca   : > { %1318 = vset.pattern.permute.xlu1 %v1566_v25  ;;  %1319 = vset.pattern.permute.xlu2 %v1567_v27  ;;  %v402_v31 = vadd.f32 %v400_v22, %v327_v19  ;;  %v403_v21 = vadd.f32 %v401_v23, %v328_v20  ;;  %v376_v37 = vmul.f32 %v1758_v6, %v320_v55  ;;  %v463_v49 = vperm.slane %v462_v33, 0 }
  0xcb   : > { %771 = vperm.xlu1 %1318, %v1704_v3   ;;  %649 = vperm.xlu2 %1319, %v1704_v3   ;;  %v464_v50 = vperm.slane %v462_v33, 1  ;;  %v367_v51 = vmul.f32 %v1774_v17, %v319_v54  ;;  %v368_v52 = vmul.f32 %v1774_v17, %v320_v55  ;;  %v1568_v56 = vmov 39  }
  0xcc   : > { %v1569_v57 = vmov 34   ;;  %vm531_vm5 = vcmp.eq.s32.totalorder %v529_v34, 1  ;;  %vm532_vm6 = vcmp.eq.s32.totalorder %v530_v35, 1  ;;  %vm465_vm8 = vcmp.eq.s32.totalorder %v463_v49, 1 }
  0xcd   : > { %vm466_vm9 = vcmp.eq.s32.totalorder %v464_v50, 1  ;;  %v1570_v22 = vmov 46   ;;  %v1571_v27 = vmov 41   ;;  %vm598_vm10 = vcmp.ge.s32.totalorder %v1776_v18, 4294967295 }
  0xce   : > { %vm599_vm11 = vcmp.lt.s32.totalorder %v1776_v18, 15  ;;  %vm595_vm13 = vcmp.lt.s32.totalorder %v1793_v29, 112 }
  0xcf   : > { %v446_v32 = vpop.permute.xlu1 %445  ;;  %v511_v43 = vpop.permute.xlu2 %510  ;;  %vm600_vm12 = vmand %vm598_vm10, %vm599_vm11  ;;  %vm741_vm10 = vcmp.lt.s32.totalorder %v1793_v29, 80 }
  0xd0   : > { %v448_v39 = vmul.f32 %v446_v32, %v1802_v41  ;;  %v449_v40 = vmul.f32 %v446_v32, %v1804_v42  ;;  %v438_v48 = vpop.permute.xlu0 %437 }
  0xd1   : > { %v440_v53 = vmul.f32 %v438_v48, %v1802_v41  ;;  %v441_v6 = vmul.f32 %v438_v48, %v1804_v42  ;;  %v1887_v41 = vsel %vm532_vm6, %v1724_v45, 0.0  ;;  %v1890_v42 = vsel %vm531_vm5, %v1720_v44, 0.0 }
  0xd2   : > { %v1875_v46 = vadd.f32 %v448_v39, %v375_v36  ;;  %v1877_v47 = vadd.f32 %v449_v40, %v376_v37  ;;  %vm745_vm5 = vcmp.lt.s32.totalorder %v1776_v18, 13 }
  0xd3   : > { %1320 = vset.pattern.permute.xlu1 %v1568_v56  ;;  %1321 = vset.pattern.permute.xlu2 %v1569_v57  ;;  %v442_v58 = vadd.f32 %v440_v53, %v367_v51  ;;  %v443_v59 = vadd.f32 %v441_v6, %v368_v52  ;;  %v1572_v51 = vmov 47   ;;  %vm746_vm6 = vmand %vm744_vm4, %vm745_vm5 }
  0xd4   : > { %714 = vperm.xlu1 %1320, %v1704_v3   ;;  %657 = vperm.xlu2 %1321, %v1704_v3  }
  0xd7   : > { %v455_v17 = vpop.permute.xlu1 %454 }
  0xd8   : > { %v457_v54 = vsel %vm456_vm7, %v1788_v26, %v455_v17  ;;  %v458_v55 = vsel %vm456_vm7, %v455_v17, %v1788_v26  ;;  %v545_v63 = vpop.permute.xlu2 %544  ;;  %vm668_vm7 = vcmp.lt.s32.totalorder %v1793_v29, 96 }
  0xd9   : > { %v467_v60 = vsel %vm465_vm8, %v458_v55, 0.0  ;;  %v468_v62 = vsel %vm466_vm9, %v457_v54, 0.0  ;;  %v547_v2 = vmul.f32 %v545_v63, %v1890_v42  ;;  %v548_v4 = vmul.f32 %v545_v63, %v1887_v41  ;;  %v479_v45 = vpop.permute.xlu0 %478 }
  0xda   : > { %v497_v13 = vmul.f32 %v1827_v0, %v467_v60  ;;  %v498_v14 = vmul.f32 %v1827_v0, %v468_v62  ;;  %v473_v15 = vmul.f32 %v1799_v38, %v467_v60  ;;  %v474_v44 = vmul.f32 %v1799_v38, %v468_v62 }
  0xdb   : > { %v513_v16 = vmul.f32 %v511_v43, %v467_v60  ;;  %v514_v19 = vmul.f32 %v511_v43, %v468_v62  ;;  %v481_v20 = vmul.f32 %v479_v45, %v467_v60  ;;  %v482_v26 = vmul.f32 %v479_v45, %v468_v62 }
  0xdc   : > { %1323 = vset.pattern.permute.xlu1 %v1570_v22  ;;  %v499_v23 = vadd.f32 %v497_v13, %v1839_v61  ;;  %v500_v25 = vadd.f32 %v498_v14, %v1841_v12  ;;  %1324 = vset.pattern.permute.xlu2 %v1571_v27  ;;  %v1903_v0 = vadd.f32 %v473_v15, %v402_v31 }
  0xdd   : > { %787 = vperm.xlu1 %1323, %v1704_v3   ;;  %v1905_v9 = vadd.f32 %v474_v44, %v403_v21  ;;  %v515_v32 = vadd.f32 %v513_v16, %v442_v58  ;;  %v483_v38 = vadd.f32 %v481_v20, %v1830_v5  ;;  %v484_v33 = vadd.f32 %v482_v26, %v1832_v7 }
  0xde   : > { %730 = vperm.xlu2 %1324, %v1704_v3   ;;  %v516_v34 = vadd.f32 %v514_v19, %v443_v59  ;;  %v601_v16 = vsel %vm600_vm12, 1, %v1519_v1 }
  0xdf   : > { %v487_v35 = vpop.permute.xlu1 %486  ;;  %v1910_v12 = vadd.f32 %v547_v2, %v483_v38  ;;  %v1912_v37 = vadd.f32 %v548_v4, %v484_v33  ;;  %v602_v20 = vperm.slane %v601_v16, 0  ;;  %v603_v26 = vperm.slane %v601_v16, 1 }
  0xe0   : > { %v489_v61 = vmul.f32 %v487_v35, %v467_v60  ;;  %v490_v36 = vmul.f32 %v487_v35, %v468_v62 }
  0xe1   : > { %v561_v39 = vpop.permute.xlu2 %560  ;;  %vm604_vm0 = vcmp.eq.s32.totalorder %v602_v20, 1  ;;  %vm605_vm2 = vcmp.eq.s32.totalorder %v603_v26, 1 }
  0xe2   : > { %v1915_v31 = vadd.f32 %v489_v61, %v1834_v8  ;;  %v1918_v21 = vadd.f32 %v490_v36, %v1836_v10  ;;  %v563_v5 = vmul.f32 %v561_v39, %v1890_v42  ;;  %v564_v7 = vmul.f32 %v561_v39, %v1887_v41  ;;  %v519_v40 = vpop.permute.xlu0 %518 }
  0xe3   : > { %v521_v49 = vmul.f32 %v519_v40, %v467_v60  ;;  %v522_v50 = vmul.f32 %v519_v40, %v468_v62 }
  0xe4   : > { %v565_v43 = vadd.f32 %v563_v5, %v499_v23  ;;  %v566_v48 = vadd.f32 %v564_v7, %v500_v25 }
  0xe5   : > { %1325 = vset.pattern.permute.xlu1 %v1572_v51  ;;  %v523_v8 = vadd.f32 %v521_v49, %v1875_v46  ;;  %v524_v10 = vadd.f32 %v522_v50, %v1877_v47  ;;  %v747_v51 = vsel %vm746_vm6, 1, %v1519_v1 }
  0xe6   : > { %1326 = vset.pattern.permute.xlu2 %v1565_v11  ;;  %795 = vperm.xlu1 %1325, %v1704_v3  }
  0xe7   : > { %803 = vperm.xlu2 %1326, %v1704_v3  }
  0xe8   : > { %v503_v52 = vpop.permute.xlu1 %502 }
  0xe9   : > { %v505_v53 = vmul.f32 %v503_v52, %v467_v60  ;;  %v506_v6 = vmul.f32 %v503_v52, %v468_v62 }
  0xea   : > { %v585_v58 = vpop.permute.xlu2 %584 }
  0xeb   : > { %v1928_v56 = vadd.f32 %v505_v53, %v1858_v28  ;;  %v1931_v57 = vadd.f32 %v506_v6, %v1860_v30  ;;  %v587_v11 = vmul.f32 %v585_v58, %v1890_v42  ;;  %v588_v59 = vmul.f32 %v585_v58, %v1887_v41  ;;  %v1939_v47 = vpop.permute.xlu0 %568 }
  0xec   : > { %v748_v58 = vperm.slane %v747_v51, 0 }
  0xed   : > { %v1935_v17 = vadd.f32 %v587_v11, %v523_v8  ;;  %v1937_v46 = vadd.f32 %v588_v59, %v524_v10  ;;  %v749_v11 = vperm.slane %v747_v51, 1 }
  0xee   : > { %vm750_vm11 = vcmp.eq.s32.totalorder %v748_v58, 1 }
  0xef   : > { %vm751_vm12 = vcmp.eq.s32.totalorder %v749_v11, 1 }
  0xf1   : > { %v537_v3 = vpop.permute.xlu1 %536 }
  0xf2   : > { %v594_v55 = vpop.permute.xlu2 %593  ;;  %v539_v8 = vmul.f32 %v537_v3, %v1890_v42  ;;  %v540_v18 = vmul.f32 %v537_v3, %v1887_v41 }
  0xf4   : > { %v610_v54 = vpop.permute.xlu0 %609  ;;  %v542_v3 = vadd.f32 %v540_v18, %v1905_v9 }
  0xfa   : > { %v1941_v60 = vpop.permute.xlu1 %552  ;;  %v1943_v62 = vpop.permute.xlu2 %625 }
  0xfb   : > { %v555_v11 = vmul.f32 %v1941_v60, %v1890_v42 }
  0xfc   : > { %v665_v28 = vpop.permute.xlu0 %664 }
 0x103   : > { %v577_v30 = vpop.permute.xlu1 %576  ;;  %v1955_v15 = vpop.permute.xlu2 %641 }
 0x104   : > { %v579_v63 = vmul.f32 %v577_v30, %v1890_v42  ;;  %v580_v2 = vmul.f32 %v577_v30, %v1887_v41  ;;  %v1951_v14 = vpop.permute.xlu0 %690  ;;  %v541_v30 = vadd.f32 %v539_v8, %v1903_v0 }
 0x106   : > { %v1947_v4 = vadd.f32 %v579_v63, %v515_v32  ;;  %v1949_v13 = vadd.f32 %v580_v2, %v516_v34  ;;  %v674_v34 = vsel %vm673_vm3, 1, %v1519_v1 }
 0x107   : > { %v675_v5 = vperm.slane %v674_v34, 0  ;;  %v676_v7 = vperm.slane %v674_v34, 1 }
 0x109   : > { %vm677_vm8 = vcmp.eq.s32.totalorder %v675_v5, 1  ;;  %vm678_vm9 = vcmp.eq.s32.totalorder %v676_v7, 1 }
 0x10b   : > { %v592_v45 = vpop.permute.xlu1 %591 }
 0x10c   : > { %v683_v22 = vpop.permute.xlu2 %682  ;;  %v596_v25 = vsel %vm595_vm13, %v592_v45, %v594_v55  ;;  %v597_v27 = vsel %vm595_vm13, %v594_v55, %v592_v45 }
 0x10d   : > { %v1957_v44 = vpop.permute.xlu0 %763  ;;  %v1967_v32 = vsel %vm604_vm0, %v596_v25, 0.0  ;;  %v1969_v38 = vsel %vm605_vm2, %v597_v27, 0.0 }
 0x10e   : > { %v613_v59 = vmul.f32 %v610_v54, %v1969_v38  ;;  %v612_v55 = vmul.f32 %v610_v54, %v1967_v32 }
 0x110   : > { %v615_v25 = vadd.f32 %v613_v59, %v542_v3  ;;  %v614_v27 = vadd.f32 %v612_v55, %v541_v30  ;;  %v556_v59 = vmul.f32 %v1941_v60, %v1887_v41 }
 0x113   : > { %v1960_v19 = vpop.permute.xlu1 %617 }
 0x114   : > { %v740_v40 = vpop.permute.xlu2 %739  ;;  %v620_v5 = vmul.f32 %v1960_v19, %v1967_v32  ;;  %v621_v7 = vmul.f32 %v1960_v19, %v1969_v38 }
 0x116   : > { %v1965_v23 = vpop.permute.xlu0 %722  ;;  %v622_v18 = vadd.f32 %v620_v5, %v1910_v12  ;;  %v623_v19 = vadd.f32 %v621_v7, %v1912_v37  ;;  %v628_v12 = vmul.f32 %v1943_v62, %v1967_v32  ;;  %v629_v37 = vmul.f32 %v1943_v62, %v1969_v38 }
 0x11c   : > { %v634_v33 = vpop.permute.xlu1 %633  ;;  %v756_v16 = vpop.permute.xlu2 %755 }
 0x11d   : > { %v636_v35 = vmul.f32 %v634_v33, %v1967_v32  ;;  %v637_v61 = vmul.f32 %v634_v33, %v1969_v38 }
 0x11f   : > { %v638_v36 = vadd.f32 %v636_v35, %v565_v43  ;;  %v639_v39 = vadd.f32 %v637_v61, %v566_v48  ;;  %v707_v49 = vpop.permute.xlu0 %706 }
 0x124   : > { %v667_v50 = vpop.permute.xlu1 %666 }
 0x125   : > { %v669_v10 = vsel %vm668_vm7, %v665_v28, %v667_v50  ;;  %v670_v52 = vsel %vm668_vm7, %v667_v50, %v665_v28 }
 0x126   : > { %v1980_v43 = vsel %vm677_vm8, %v669_v10, 0.0  ;;  %v1982_v48 = vsel %vm678_vm9, %v670_v52, 0.0 }
 0x127   : > { %v709_v53 = vmul.f32 %v707_v49, %v1980_v43  ;;  %v710_v6 = vmul.f32 %v707_v49, %v1982_v48  ;;  %v686_v2 = vmul.f32 %v683_v22, %v1982_v48  ;;  %v685_v45 = vmul.f32 %v683_v22, %v1980_v43 }
 0x128   : > { %v780_v26 = vpop.permute.xlu0 %779  ;;  %v694_v8 = vmul.f32 %v1951_v14, %v1982_v48  ;;  %v693_v10 = vmul.f32 %v1951_v14, %v1980_v43 }
 0x129   : > { %v711_v63 = vadd.f32 %v709_v53, %v638_v36  ;;  %v712_v28 = vadd.f32 %v710_v6, %v639_v39  ;;  %v688_v9 = vadd.f32 %v686_v2, %v615_v25  ;;  %v687_v35 = vadd.f32 %v685_v45, %v614_v27  ;;  %v650_v53 = vpop.permute.xlu2 %649 }
 0x12a   : > { %v696_v55 = vadd.f32 %v694_v8, %v623_v19  ;;  %v695_v14 = vadd.f32 %v693_v10, %v622_v18 }
 0x12c   : > { %v738_v20 = vpop.permute.xlu1 %737 }
 0x12d   : > { %v742_v54 = vsel %vm741_vm10, %v738_v20, %v740_v40  ;;  %v743_v33 = vsel %vm741_vm10, %v740_v40, %v738_v20 }
 0x12e   : > { %v1993_v0 = vsel %vm750_vm11, %v742_v54, 0.0  ;;  %v1995_v34 = vsel %vm751_vm12, %v743_v33, 0.0  ;;  %v571_v33 = vmul.f32 %v1939_v47, %v1890_v42 }
 0x12f   : > { %v782_v61 = vmul.f32 %v780_v26, %v1993_v0  ;;  %v783_v36 = vmul.f32 %v780_v26, %v1995_v34  ;;  %v759_v22 = vmul.f32 %v756_v16, %v1995_v34  ;;  %v758_v39 = vmul.f32 %v756_v16, %v1993_v0 }
 0x130   : > { %v767_v6 = vmul.f32 %v1957_v44, %v1995_v34  ;;  %v766_v58 = vmul.f32 %v1957_v44, %v1993_v0  ;;  %v558_v44 = vadd.f32 %v556_v59, %v1918_v21 }
 0x131   : > { %v2005_v40 = vadd.f32 %v782_v61, %v711_v63  ;;  %v2007_v49 = vadd.f32 %v783_v36, %v712_v28  ;;  %v761_v50 = vadd.f32 %v759_v22, %v688_v9  ;;  %v760_v51 = vadd.f32 %v758_v39, %v687_v35  ;;  %v658_v27 = vpop.permute.xlu2 %657 }
 0x132   : > { %v769_v30 = vadd.f32 %v767_v6, %v696_v55  ;;  %v768_v63 = vadd.f32 %v766_v58, %v695_v14  ;;  %v557_v28 = vadd.f32 %v555_v11, %v1915_v31  ;;  %v631_v45 = vadd.f32 %v629_v37, %v558_v44 }
 0x133   : > { %812 = vrot.lane.b32.xlu2 %v761_v50, %s1573_s24  ;;  %810 = vrot.lane.b32.xlu1 %v760_v51, %s1573_s24  ;;  %v572_v9 = vmul.f32 %v1939_v47, %v1887_v41  ;;  %v644_v61 = vmul.f32 %v1955_v15, %v1967_v32  ;;  %v645_v36 = vmul.f32 %v1955_v15, %v1969_v38 }
 0x134   : > { %v699_v52 = vpop.permute.xlu1 %698  ;;  %v630_v60 = vadd.f32 %v628_v12, %v557_v28  ;;  %v573_v22 = vadd.f32 %v571_v33, %v1928_v56  ;;  %v653_v15 = vmul.f32 %v650_v53, %v1969_v38  ;;  %v660_v56 = vmul.f32 %v658_v27, %v1967_v32 }
 0x135   : > { %v701_v3 = vmul.f32 %v699_v52, %v1980_v43  ;;  %v702_v2 = vmul.f32 %v699_v52, %v1982_v48  ;;  %v574_v39 = vadd.f32 %v572_v9, %v1931_v57  ;;  %v652_v52 = vmul.f32 %v650_v53, %v1967_v32 }
 0x136   : > { %v646_v50 = vadd.f32 %v644_v61, %v573_v22  ;;  %v655_v11 = vadd.f32 %v653_v15, %v1949_v13  ;;  %v662_v59 = vadd.f32 %v660_v56, %v1935_v17  ;;  %v725_v53 = vmul.f32 %v1965_v23, %v1980_v43 }
 0x137   : > { %v703_v20 = vadd.f32 %v701_v3, %v630_v60  ;;  %v704_v26 = vadd.f32 %v702_v2, %v631_v45  ;;  %v647_v42 = vadd.f32 %v645_v36, %v574_v39  ;;  %v654_v58 = vadd.f32 %v652_v52, %v1947_v4 }
 0x138   : > { %v726_v32 = vmul.f32 %v1965_v23, %v1982_v48  ;;  %v661_v13 = vmul.f32 %v658_v27, %v1969_v38  ;;  %v301_v38 = vld [vmem:[#allocation9 + $0x1] ss:$2 sm:$0x3] }
 0x139   : > { %v731_v35 = vpop.permute.xlu2 %730  ;;  %v727_v37 = vadd.f32 %v725_v53, %v654_v58  ;;  %vm817_vm13 = vcmp.ge.s32.totalorder %v301_v38, 3  ;;  %vm818_vm14 = vcmp.lt.s32.totalorder %v301_v38, 19  ;;  %vm836_vm15 = vcmp.ge.s32.totalorder %v301_v38, 2 }
 0x13a   : > { %v733_v6 = vmul.f32 %v731_v35, %v1980_v43  ;;  %v663_v23 = vadd.f32 %v661_v13, %v1937_v46  ;;  %vm837_vm0 = vcmp.lt.s32.totalorder %v301_v38, 18  ;;  %vm855_vm2 = vcmp.ge.s32.totalorder %v301_v38, 1  ;;  %vm819_vm6 = vmand %vm817_vm13, %vm818_vm14 }
 0x13b   : > { %831 = vrot.lane.b32.xlu2 %v769_v30, %s1574_s25  ;;  %829 = vrot.lane.b32.xlu1 %v768_v63, %s1574_s25  ;;  %v728_v30 = vadd.f32 %v726_v32, %v655_v11  ;;  %vm856_vm3 = vcmp.lt.s32.totalorder %v301_v38, 17  ;;  %vm867_vm4 = vcmp.ge.s32.totalorder %v301_v38, 0  ;;  %vm868_vm5 = vcmp.lt.s32.totalorder %v301_v38, 16  ;;  %vm838_vm7 = vmand %vm836_vm15, %vm837_vm0 }
 0x13c   : > { %v735_v14 = vadd.f32 %v733_v6, %v662_v59  ;;  %vm857_vm8 = vmand %vm855_vm2, %vm856_vm3  ;;  %vm886_vm10 = vcmp.ge.s32.totalorder %v301_v38, 4294967295  ;;  %vm887_vm11 = vcmp.lt.s32.totalorder %v301_v38, 15  ;;  %vm905_vm12 = vcmp.ge.s32.totalorder %v301_v38, 4294967294 }
 0x13d   : > { %v772_v16 = vpop.permute.xlu1 %771  ;;  %vm869_vm9 = vmand %vm867_vm4, %vm868_vm5  ;;  %vm906_vm13 = vcmp.lt.s32.totalorder %v301_v38, 14  ;;  %vm833_vm14 = vcmp.lt.s32.totalorder %v1793_v29, 2  ;;  %vm814_vm0 = vcmp.lt.s32.totalorder %v1793_v29, 3 }
 0x13e   : > { %v774_v62 = vmul.f32 %v772_v16, %v1993_v0  ;;  %v775_v25 = vmul.f32 %v772_v16, %v1995_v34  ;;  %vm888_vm15 = vmand %vm886_vm10, %vm887_vm11  ;;  %vm925_vm10 = vcmp.lt.s32.totalorder %v301_v38, 13 }
 0x140   : > { %v776_v31 = vadd.f32 %v774_v62, %v703_v20  ;;  %v777_v54 = vadd.f32 %v775_v25, %v704_v26  ;;  %v858_v26 = vsel %vm857_vm8, 1, %v1519_v1  ;;  %v870_v62 = vsel %vm869_vm9, 1, %v1519_v1 }
 0x141   : > { %v804_v19 = vpop.permute.xlu2 %803  ;;  %v871_v33 = vperm.slane %v870_v62, 0  ;;  %v860_v36 = vperm.slane %v858_v26, 1  ;;  %vm924_vm9 = vcmp.ge.s32.totalorder %v301_v38, 4294967293 }
 0x142   : > { %v806_v55 = vmul.f32 %v804_v19, %v1993_v0  ;;  %v807_v3 = vmul.f32 %v804_v19, %v1995_v34 }
 0x143   : > { %850 = vrot.lane.b32.xlu2 %v777_v54, %s1575_s27  ;;  %848 = vrot.lane.b32.xlu1 %v776_v31, %s1575_s27  ;;  %vm2094_vm11 = vcmp.eq.s32.totalorder %v860_v36, 1  ;;  %s1448_s27 = scalar_lea.hbm %s2207_s3, 4 }
 0x144   : > { %v808_v28 = vadd.f32 %v806_v55, %v735_v14  ;;  %p1450_p12 = scmp.lt.s32.totalorder %s1448_s27, %s1444_s18 }
 0x146   : > { %v715_v21 = vpop.permute.xlu1 %714  ;;  %p1451_p13 = por %p1450_p12, %p1449_p11 }
 0x147   : > { %v717_v5 = vmul.f32 %v715_v21, %v1980_v43  ;;  %v718_v7 = vmul.f32 %v715_v21, %v1982_v48  ;;  %v734_v43 = vmul.f32 %v731_v35, %v1982_v48  ;;  %v820_v48 = vsel %vm819_vm6, 1, %v1519_v1 }
 0x148   : > { %v821_v25 = vperm.slane %v820_v48, 0  ;;  %v822_v27 = vperm.slane %v820_v48, 1  ;;  %v859_v21 = vperm.slane %v858_v26, 0  ;;  %v872_v35 = vperm.slane %v870_v62, 1  ;;  %p1452_p0 = pnand %p1451_p13, %p1447_p7 }
 0x149   : > { %v719_v8 = vadd.f32 %v717_v5, %v646_v50  ;;  %v720_v41 = vadd.f32 %v718_v7, %v647_v42  ;;  %v736_v2 = vadd.f32 %v734_v43, %v663_v23  ;;  %vm852_vm6 = vcmp.lt.s32.totalorder %v1793_v29, 1 }
 0x14a   : > { %vm2071_vm2 = vcmp.eq.s32.totalorder %v821_v25, 1  ;;  %vm2075_vm3 = vcmp.eq.s32.totalorder %v822_v27, 1  ;;  %vm2089_vm8 = vcmp.eq.s32.totalorder %v859_v21, 1 }
 0x14f   : > { %v788_v51 = vpop.permute.xlu1 %787 }
 0x150   : > { %v790_v47 = vmul.f32 %v788_v51, %v1993_v0  ;;  %v791_v10 = vmul.f32 %v788_v51, %v1995_v34 }
 0x152   : > { %v792_v57 = vadd.f32 %v790_v47, %v719_v8  ;;  %v793_v18 = vadd.f32 %v791_v10, %v720_v41  ;;  %v889_v8 = vsel %vm888_vm15, 1, %v1519_v1  ;;  %vm2116_vm15 = vcmp.eq.s32.totalorder %v872_v35, 1 }
 0x153   : > { %v890_v19 = vperm.slane %v889_v8, 0  ;;  %v891_v6 = vperm.slane %v889_v8, 1 }
 0x154   : > { %881 = vrot.lane.b32.xlu2 %v793_v18, %s1576_s28  ;;  %879 = vrot.lane.b32.xlu1 %v792_v57, %s1576_s28 }
 0x158   : > { %v796_v12 = vpop.permute.xlu1 %795 }
 0x159   : > { %v798_v63 = vmul.f32 %v796_v12, %v1993_v0  ;;  %v799_v4 = vmul.f32 %v796_v12, %v1995_v34  ;;  %v809_v0 = vadd.f32 %v807_v3, %v736_v2  ;;  %v839_v34 = vsel %vm838_vm7, 1, %v1519_v1  ;;  %vm907_vm7 = vmand %vm905_vm12, %vm906_vm13 }
 0x15a   : > { %v840_v31 = vperm.slane %v839_v34, 0  ;;  %v841_v54 = vperm.slane %v839_v34, 1  ;;  %v908_v56 = vsel %vm907_vm7, 1, %v1519_v1  ;;  %vm883_vm12 = vcmp.lt.s32.totalorder %v1793_v29, 127  ;;  %vm926_vm13 = vmand %vm924_vm9, %vm925_vm10 }
 0x15b   : > { %v800_v17 = vadd.f32 %v798_v63, %v727_v37  ;;  %v801_v44 = vadd.f32 %v799_v4, %v728_v30  ;;  %v909_v32 = vperm.slane %v908_v56, 0  ;;  %v910_v14 = vperm.slane %v908_v56, 1 }
 0x15c   : > { %917 = vrot.lane.b32.xlu2 %v808_v28, %s1577_s29  ;;  %vm2079_vm4 = vcmp.eq.s32.totalorder %v840_v31, 1  ;;  %vm2083_vm5 = vcmp.eq.s32.totalorder %v841_v54, 1  ;;  %vm936_vm9 = vcmask 1041408  }
 0x15d   : > { %898 = vrot.lane.b32.xlu0 %v800_v17, %s1578_s30  ;;  %900 = vrot.lane.b32.xlu1 %v801_v44, %s1578_s30  ;;  %v927_v44 = vsel %vm926_vm13, 1, %v1519_v1 }
 0x15e   : > { %v928_v38 = vperm.slane %v927_v44, 0  ;;  %v929_v1 = vperm.slane %v927_v44, 1 }
 0x160   : > { %vm930_vm7 = vcmp.eq.s32.totalorder %v928_v38, 1 }
 0x165   : > { %919 = vrot.lane.b32.xlu0 %v809_v0, %s1577_s29 }
 0x18d   : > { %v813_v45 = vpop.permute.xlu2 %812 }
 0x195   : > { %v832_v20 = vpop.permute.xlu2 %831 }
 0x19d   : > { %v851_v9 = vpop.permute.xlu2 %850 }
 0x1a5   : > { %v811_v60 = vpop.permute.xlu1 %810 }
 0x1a6   : > { %v815_v41 = vsel %vm814_vm0, %v811_v60, %v813_v45  ;;  %v816_v47 = vsel %vm814_vm0, %v813_v45, %v811_v60  ;;  %vm2120_vm0 = vcmp.eq.s32.totalorder %v890_v19, 1 }
 0x1a7   : > { %v825_v58 = vsel %vm2071_vm2, %v816_v47, 0.0  ;;  %v826_v11 = vsel %vm2075_vm3, %v815_v41, 0.0  ;;  %vm2124_vm2 = vcmp.eq.s32.totalorder %v891_v6, 1  ;;  %vm902_vm3 = vcmp.lt.s32.totalorder %v1793_v29, 126 }
 0x1ad   : > { %v830_v16 = vpop.permute.xlu1 %829 }
 0x1ae   : > { %v834_v50 = vsel %vm833_vm14, %v830_v16, %v832_v20  ;;  %v835_v42 = vsel %vm833_vm14, %v832_v20, %v830_v16  ;;  %v882_v59 = vpop.permute.xlu2 %881  ;;  %vm2112_vm14 = vcmp.eq.s32.totalorder %v871_v33, 1 }
 0x1af   : > { %v844_v57 = vsel %vm2079_vm4, %v835_v42, 0.0  ;;  %v845_v18 = vsel %vm2083_vm5, %v834_v50, 0.0  ;;  %vm2134_vm4 = vcmp.eq.s32.totalorder %v909_v32, 1  ;;  %vm2138_vm5 = vcmp.eq.s32.totalorder %v910_v14, 1 }
 0x1b0   : > { %v846_v30 = vadd.f32 %v844_v57, %v825_v58  ;;  %v847_v63 = vadd.f32 %v845_v18, %v826_v11  ;;  %v875_v20 = vsel %vm2112_vm14, %v2005_v40, 0.0 }
 0x1b5   : > { %v849_v46 = vpop.permute.xlu1 %848 }
 0x1b6   : > { %v853_v52 = vsel %vm852_vm6, %v849_v46, %v851_v9  ;;  %v854_v15 = vsel %vm852_vm6, %v851_v9, %v849_v46  ;;  %v876_v46 = vsel %vm2116_vm15, %v2007_v49, 0.0  ;;  %vm921_vm6 = vcmp.lt.s32.totalorder %v1793_v29, 125  ;;  %v918_v49 = vpop.permute.xlu2 %917 }
 0x1b7   : > { %v863_v55 = vsel %vm2089_vm8, %v854_v15, 0.0  ;;  %v864_v53 = vsel %vm2094_vm11, %v853_v52, 0.0  ;;  %vm931_vm8 = vcmp.eq.s32.totalorder %v929_v1, 1 }
 0x1b8   : > { %v865_v43 = vadd.f32 %v863_v55, %v846_v30  ;;  %v866_v23 = vadd.f32 %v864_v53, %v847_v63 }
 0x1ba   : > { %v877_v26 = vadd.f32 %v875_v20, %v865_v43  ;;  %v878_v62 = vadd.f32 %v876_v46, %v866_v23 }
 0x1c6   : > { %v880_v22 = vpop.permute.xlu1 %879 }
 0x1c7   : > { %v884_v3 = vsel %vm883_vm12, %v880_v22, %v882_v59  ;;  %v885_v2 = vsel %vm883_vm12, %v882_v59, %v880_v22 }
 0x1c8   : > { %v894_v48 = vsel %vm2120_vm0, %v884_v3, 0.0  ;;  %v895_v34 = vsel %vm2124_vm2, %v885_v2, 0.0 }
 0x1c9   : > { %v896_v40 = vadd.f32 %v894_v48, %v877_v26  ;;  %v897_v31 = vadd.f32 %v895_v34, %v878_v62 }
 0x1cf   : > { %v899_v13 = vpop.permute.xlu0 %898  ;;  %v901_v17 = vpop.permute.xlu1 %900 }
 0x1d0   : > { %v903_v45 = vsel %vm902_vm3, %v899_v13, %v901_v17  ;;  %v904_v16 = vsel %vm902_vm3, %v901_v17, %v899_v13  ;;  %vm996_vm3 = vcmp.lt.s32.totalorder %v306_v24, 256 }
 0x1d1   : > { %v913_v25 = vsel %vm2134_vm4, %v903_v45, 0.0  ;;  %v914_v27 = vsel %vm2138_vm5, %v904_v16, 0.0 }
 0x1d2   : > { %v915_v21 = vadd.f32 %v913_v25, %v896_v40  ;;  %v916_v33 = vadd.f32 %v914_v27, %v897_v31 }
 0x1d7   : > { %v920_v54 = vpop.permute.xlu0 %919 }
 0x1d8   : > { %v922_v9 = vsel %vm921_vm6, %v918_v49, %v920_v54  ;;  %v923_v35 = vsel %vm921_vm6, %v920_v54, %v918_v49 }
 0x1d9   : > { %v932_v61 = vsel %vm930_vm7, %v922_v9, 0.0  ;;  %v933_v36 = vsel %vm931_vm8, %v923_v35, 0.0 }
 0x1da   : > { %v934_v22 = vadd.f32 %v932_v61, %v915_v21  ;;  %v935_v39 = vadd.f32 %v933_v36, %v916_v33 }
 0x1dc   : > { %v937_v5 = vsel %vm936_vm9, %v934_v22, 0.0  ;;  %v944_v7 = vsel %vm936_vm9, %v935_v39, 0.0 }
 0x1dd   : > { %v938_v50 = vrot.slane %v937_v5, 4  ;;  %v945_v42 = vrot.slane %v944_v7, 4 }
 0x1df   : > { %v939_v29 = vadd.f32 %v938_v50, %v937_v5  ;;  %v946_v51 = vadd.f32 %v945_v42, %v944_v7 }
 0x1e1   : > { %v940_v8 = vrot.slane %v939_v29, 2  ;;  %v947_v41 = vrot.slane %v946_v51, 2 }
 0x1e3   : > { %v941_v47 = vadd.f32 %v940_v8, %v939_v29  ;;  %v948_v10 = vadd.f32 %v947_v41, %v946_v51 }
 0x1e5   : > { %v942_v52 = vrot.slane %v941_v47, 1  ;;  %v949_v15 = vrot.slane %v948_v10, 1 }
 0x1e7   : > { %v943_v56 = vadd.f32 %v942_v52, %v941_v47  ;;  %v950_v57 = vadd.f32 %v949_v15, %v948_v10 }
 0x1e9   : > { %v1129_v18 = vmul.f32 -1.442695, %v943_v56  ;;  %v1130_v19 = vmul.f32 -1.442695, %v950_v57 }
 0x1eb   : > { %1330 = vpow2.f32 %v1129_v18 }
 0x1ec   : > { %1332 = vpow2.f32 %v1130_v19 }
 0x1f1   : > { %v1331_v6 = vpop.eup %1330 }
 0x1f2   : > { %v1333_v58 = vpop.eup %1332  ;;  %v957_v11 = vadd.f32 1.0, %v1331_v6 }
 0x1f3   : > { %v958_v59 = vadd.f32 1.0, %v1333_v58 }
 0x1f4   : > { %1334 = vrcp.f32 %v957_v11  ;;  %vm964_vm12 = vweird.f32 %v957_v11  ;;  %v970_v17 = vand.u32 2147483648, %v957_v11  ;;  %v968_v43 = vand.u32 2147483647, %v957_v11 }
 0x1f5   : > { %1336 = vrcp.f32 %v958_v59  ;;  %v985_v63 = vand.u32 2147483648, %v958_v59  ;;  %v983_v28 = vand.u32 2147483647, %v958_v59  ;;  %vm979_vm14 = vweird.f32 %v958_v59 }
 0x1f6   : > { %v971_v60 = vor.u32 1.1754944e-38, %v970_v17  ;;  %vm969_vm2 = vcmp.eq.f32.partialorder %v968_v43, 8.507059e+37 }
 0x1f7   : > { %v986_v3 = vor.u32 1.1754944e-38, %v985_v63  ;;  %vm984_vm0 = vcmp.eq.f32.partialorder %v983_v28, 8.507059e+37 }
 0x1fa   : > { %v1335_v55 = vpop.eup %1334 }
 0x1fb   : > { %v1337_v53 = vpop.eup %1336  ;;  %v960_v32 = vmul.f32 %v1335_v55, %v957_v11  ;;  %vm965_vm10 = vweird.f32 %v1335_v55 }
 0x1fc   : > { %v975_v14 = vmul.f32 %v1337_v53, %v958_v59  ;;  %vm980_vm11 = vweird.f32 %v1337_v53  ;;  %vm2162_vm13 = vmor %vm964_vm12, %vm965_vm10 }
 0x1fd   : > { %v961_v12 = vsub.f32 1.0, %v960_v32  ;;  %vm981_vm15 = vmor %vm979_vm14, %vm980_vm11 }
 0x1fe   : > { %v976_v37 = vsub.f32 1.0, %v975_v14 }
 0x1ff   : > { %v962_v30 = vmul.f32 %v1335_v55, %v961_v12 }
 0x200   : > { %v977_v4 = vmul.f32 %v1337_v53, %v976_v37 }
 0x201   : > { %v963_v13 = vadd.f32 %v1335_v55, %v962_v30 }
 0x202   : > { %v978_v23 = vadd.f32 %v1337_v53, %v977_v4 }
 0x203   : > { %v967_v2 = vsel %vm2162_vm13, %v1335_v55, %v963_v13 }
 0x204   : > { %v982_v0 = vsel %vm981_vm15, %v1337_v53, %v978_v23  ;;  %v972_v38 = vsel %vm969_vm2, %v971_v60, %v967_v2 }
 0x205   : > { %v987_v45 = vsel %vm984_vm0, %v986_v3, %v982_v0 }
 0x206   : > { %v991_v16 = vrot.slane %v987_v45, 7 }
 0x208   : > { %v992_v1 = vsel %vm296_vm1, %v972_v38, %v991_v16 }
 0x209   : > { %998 = vst.msk [vmem:[%s233_s15] sm:$0x3] %vm996_vm3, %v992_v1 }
 0x20a   : > { %1455 = shalt.err (!%p1452_p0)
}
 0x20b   : > { %1146 = dma.vmem_to_hbm [thread:$0]  (%p1671_p2), %s1013_s21, 32, %s1015_s26, %s1000_s11  }
 0x20c PF: > { %s1026_s5 = sand.u32 1, %s1494_s12   ;;  %p1160_p4 = pnand %p1120_p8, %p1644_p5 }
 0x20d   : > { %s1027_s30 = scalar_lea.sflag [#allocation6], %s1026_s5 }
 0x20e   : > { %p1161_p6 = pneg %p1160_p4 }
 0x210   : > { %1489 = dma.done.wait (%p1161_p6), %s1027_s30, 32  }
 0x211   : > { %1491 = vsyncadd (%p1161_p6), %s1027_s30, 4294967264  ;;  %s20_s17 = sadd.s32 1, %s1514_s17   ;;  %s2241_s12 = smov %s1498_s13 }
 0x212   : > { %p17_p9 = scmp.ge.s32.totalorder %s20_s17, 4   ;;  %s2242_s13 = smov %s1502_s14 }
 0x213   : > { %s2243_s14 = smov %s1681_s23  ;;  %s2244_s15 = smov %s1510_s16 }
 0x214   : > { %s2245_s16 = smov %s2247_s7  ;;  %19 = sbr.rel (!%p17_p9) target bundleno = 7 (0x7), region = 95 }
 0x219   :  { %1033 = vsyncpa [#allocation5], 1 }
 0x21a   :  { %1035 = vsyncpa [#allocation5 + $0x1], 1 }
 0x21b   :  { %1036 = vsyncpa [#allocation8], 1 }
 0x21c   :  { %1037 = vsyncpa [#allocation6], 1 }
 0x21d   :  { %1039 = vsyncpa [#allocation6 + $0x1], 1 }

</bundles_post_ra>
